<compile_context>
chip_gen: v7x
topology: tpu7x:2x2x1
jax: 0.10.0
libtpu: 0.0.40
codegen_flags: <defaults>
</compile_context>

<pallas_src>
import jax
import jax.numpy as jnp
from jax.experimental import pallas as pl
from jax.experimental.pallas import tpu as pltpu

SEQ_LEN = 30
FEAT = 51
IN_SIZE = (SEQ_LEN - 1) * FEAT      # 1479
K_PAD = 1536                        # 12 * 128  (padded contraction dim)
HIDDEN = 40                         # num_hidden_state
LIN1 = 60
LIN2 = 50
GATE_PAD = 128                      # each gate gets one 128-lane slot
N_GATES = 3                         # i, g, o  (f is dead since c0 == 0)
OUT_PAD = 128                       # lane-dense output width (valid cols: 50)


def _round_up(n, m):
    return ((n + m - 1) // m) * m


def pred_lstm_kernel(x_ref, wg_ref, bg_ref, w12_ref, b12_ref, out_ref):
    # x: (TB, K_PAD) bf16; wg: (K_PAD, 3*128) bf16; biases / w12 / out: f32
    x = x_ref[...]

    # ---- single fused gate matmul (i | g | o), f32 accumulation ----
    gates = jnp.dot(x, wg_ref[...], preferred_element_type=jnp.float32)
    gates = gates + bg_ref[...]                                   # (TB, 384)

    i_gate = jax.nn.sigmoid(gates[:, 0:GATE_PAD])                 # (TB, 128)
    g_gate = jnp.tanh(gates[:, GATE_PAD:2 * GATE_PAD])            # (TB, 128)
    o_gate = jax.nn.sigmoid(gates[:, 2 * GATE_PAD:3 * GATE_PAD])  # (TB, 128)

    # c1 = i*g (f-gate dead), h1 = o*tanh(c1).
    # Padded columns: g = tanh(0) = 0  ->  h1 is exactly 0 there, so the
    # zero-padded rows of w12 below never contribute.
    h1 = o_gate * jnp.tanh(i_gate * g_gate)                       # (TB, 128) f32

    # ---- folded Linear(40,60)+Linear(60,50) as one affine map ----
    y = jnp.dot(h1, w12_ref[...], preferred_element_type=jnp.float32)
    out_ref[...] = (y + b12_ref[...]).astype(out_ref.dtype)       # (TB, 128)


def pred_lstm_forward(x, fused_params, *, tb=512):
    """x: (B, seq_len-1, 51) float32 -> (B, 50) float32."""
    B = x.shape[0]
    x_flat = x.reshape(B, -1).astype(jnp.float32)                 # (B, 1479)

    TB = min(tb, _round_up(B, 8))
    B_pad = _round_up(B, TB)

    # zero-pad batch and contraction dim once in the wrapper, cast to bf16
    x_pad = (jnp.zeros((B_pad, K_PAD), jnp.float32)
             .at[:B, :IN_SIZE].set(x_flat)
             .astype(jnp.bfloat16))

    w_gates, b_gates, w12, b12 = fused_params
    grid = (B_pad // TB,)

    out = pl.pallas_call(
        pred_lstm_kernel,
        out_shape=jax.ShapeDtypeStruct((B_pad, OUT_PAD), jnp.float32),
        grid=grid,
        in_specs=[
            pl.BlockSpec((TB, K_PAD), lambda i: (i, 0)),                     # x tile
            pl.BlockSpec((K_PAD, N_GATES * GATE_PAD), lambda i: (0, 0)),     # resident
            pl.BlockSpec((1, N_GATES * GATE_PAD), lambda i: (0, 0)),         # resident
            pl.BlockSpec((GATE_PAD, OUT_PAD), lambda i: (0, 0)),             # resident
            pl.BlockSpec((1, OUT_PAD), lambda i: (0, 0)),                    # resident
        ],
        out_specs=pl.BlockSpec((TB, OUT_PAD), lambda i: (i, 0)),
        compiler_params=pltpu.CompilerParams(
            dimension_semantics=("parallel",),
            vmem_limit_bytes=32 * 1024 * 1024),
    )(x_pad, w_gates, b_gates, w12, b12)

    return out[:B, :LIN2]


def init_params(key):
    """Deterministic init matching the PyTorch layer shapes.

    Returns (fused_params_for_kernel, raw_params_for_reference).
    """
    ks = jax.random.split(key, 8)
    k_lstm = 1.0 / jnp.sqrt(HIDDEN)

    # nn.LSTM weights: W_ih (4H, IN), b_ih (4H,), b_hh (4H,)  [gate order i,f,g,o]
    w_ih = jax.random.uniform(ks[0], (4 * HIDDEN, IN_SIZE), jnp.float32, -k_lstm, k_lstm)
    b_ih = jax.random.uniform(ks[1], (4 * HIDDEN,), jnp.float32, -k_lstm, k_lstm)
    b_hh = jax.random.uniform(ks[2], (4 * HIDDEN,), jnp.float32, -k_lstm, k_lstm)
    b_all = b_ih + b_hh

    def gate(mat, g):
        return mat[g * HIDDEN:(g + 1) * HIDDEN]

    # W_hh multiplies h0 == 0 and the f-gate multiplies c0 == 0: both dropped.
    wi, wg, wo = gate(w_ih, 0).T, gate(w_ih, 2).T, gate(w_ih, 3).T       # (IN, H)
    bi, bg, bo = (gate(b_all, g).reshape(1, HIDDEN) for g in (0, 2, 3))  # (1, H)

    # nn.Linear(40, 60) and nn.Linear(60, 50)
    k1 = 1.0 / jnp.sqrt(HIDDEN)
    W1 = jax.random.uniform(ks[3], (LIN1, HIDDEN), jnp.float32, -k1, k1)
    b1 = jax.random.uniform(ks[4], (LIN1,), jnp.float32, -k1, k1)
    k2 = 1.0 / jnp.sqrt(LIN1)
    W2 = jax.random.uniform(ks[5], (LIN2, LIN1), jnp.float32, -k2, k2)
    b2 = jax.random.uniform(ks[6], (LIN2,), jnp.float32, -k2, k2)

    # ---- fused, lane-padded kernel params ----
    w_gates = jnp.zeros((K_PAD, N_GATES * GATE_PAD), jnp.float32)
    w_gates = w_gates.at[:IN_SIZE, 0:HIDDEN].set(wi)
    w_gates = w_gates.at[:IN_SIZE, GATE_PAD:GATE_PAD + HIDDEN].set(wg)
    w_gates = w_gates.at[:IN_SIZE, 2 * GATE_PAD:2 * GATE_PAD + HIDDEN].set(wo)
    w_gates = w_gates.astype(jnp.bfloat16)

    b_gates = jnp.zeros((1, N_GATES * GATE_PAD), jnp.float32)
    b_gates = b_gates.at[:, 0:HIDDEN].set(bi)
    b_gates = b_gates.at[:, GATE_PAD:GATE_PAD + HIDDEN].set(bg)
    b_gates = b_gates.at[:, 2 * GATE_PAD:2 * GATE_PAD + HIDDEN].set(bo)

    # fold the two (activation-free) Linears into one affine map, f32
    W12 = W1.T @ W2.T                       # (40, 50)
    b12 = b1 @ W2.T + b2                    # (50,)
    w12_pad = jnp.zeros((GATE_PAD, OUT_PAD), jnp.float32).at[:HIDDEN, :LIN2].set(W12)
    b12_pad = jnp.zeros((1, OUT_PAD), jnp.float32).at[0, :LIN2].set(b12)

    fused = (w_gates, b_gates, w12_pad, b12_pad)
    raw = (wi, wg, wo, bi, bg, bo, W1, b1, W2, b2)
    return fused, raw


def reference_forward(x, raw_params, emulate_bf16=True):
    """Pure-JAX reference mirroring the PyTorch forward (unfused, unpadded)."""
    (wi, wg, wo, bi, bg, bo, W1, b1, W2, b2) = raw_params
    xf = x.reshape(x.shape[0], -1).astype(jnp.float32)

    cast = (lambda a: a.astype(jnp.bfloat16)) if emulate_bf16 else (lambda a: a)
    dot = lambda a, b: jnp.dot(cast(a), cast(b), preferred_element_type=jnp.float32)

    i = jax.nn.sigmoid(dot(xf, wi) + bi)
    g = jnp.tanh(dot(xf, wg) + bg)
    o = jax.nn.sigmoid(dot(xf, wo) + bo)
    h = o * jnp.tanh(i * g)                 # single LSTM step, h0 = c0 = 0
    y1 = h @ W1.T + b1
    y2 = y1 @ W2.T + b2
    return y2


if __name__ == "__main__":
    key = jax.random.PRNGKey(0)
    k_x, k_p = jax.random.split(key)

    B = 2
    x = jax.random.normal(k_x, (B, SEQ_LEN - 1, FEAT), dtype=jnp.float32)
    fused_params, raw_params = init_params(k_p)

    out = pred_lstm_forward(x, fused_params)
    out = jax.block_until_ready(out)
    assert out.shape == (B, LIN2), out.shape

    # strict check vs. a JAX path using the same bf16 gate-matmul precision
    ref_bf16 = reference_forward(x, raw_params, emulate_bf16=True)
    assert jnp.allclose(out, ref_bf16, atol=2e-3, rtol=2e-3), "mismatch vs bf16 reference"

    # looser check vs. the full-f32 PyTorch-equivalent forward (bf16 rounding only)
    ref_f32 = reference_forward(x, raw_params, emulate_bf16=False)
    assert jnp.allclose(out, ref_f32, atol=5e-2, rtol=5e-2), "mismatch vs f32 reference"

    print("KERNEL_OK")
</pallas_src>

<mosaic_0001>
module attributes {stable_mosaic.version = 11 : i64} {
  func.func @pred_lstm_kernel(%arg0: i32, %arg1: memref<8x1536xbf16, #tpu.memory_space<vmem>>, %arg2: memref<1536x384xbf16, #tpu.memory_space<vmem>>, %arg3: memref<1x384xf32, #tpu.memory_space<vmem>>, %arg4: memref<128x128xf32, #tpu.memory_space<vmem>>, %arg5: memref<1x128xf32, #tpu.memory_space<vmem>>, %arg6: memref<8x128xf32, #tpu.memory_space<vmem>>) attributes {dimension_semantics = [#tpu.dimension_semantics<parallel>], iteration_bounds = array<i64: 1>, scalar_prefetch = 0 : i64, scratch_operands = 0 : i64, tpu.core_type = #tpu.core_type<tc>, window_params = [{transform_indices = @transform_0, window_bounds = array<i64: 8, 1536>}, {pipeline_mode = #tpu.pipeline_mode<synchronous>, transform_indices = @transform_1, window_bounds = array<i64: 1536, 384>}, {pipeline_mode = #tpu.pipeline_mode<synchronous>, transform_indices = @transform_2, window_bounds = array<i64: 1, 384>}, {pipeline_mode = #tpu.pipeline_mode<synchronous>, transform_indices = @transform_3, window_bounds = array<i64: 128, 128>}, {pipeline_mode = #tpu.pipeline_mode<synchronous>, transform_indices = @transform_4, window_bounds = array<i64: 1, 128>}, {transform_indices = @transform_5, window_bounds = array<i64: 8, 128>}]} {
    %c0 = arith.constant 0 : index
    %c0_0 = arith.constant 0 : index
    %0 = vector.load %arg1[%c0, %c0_0] : memref<8x1536xbf16, #tpu.memory_space<vmem>>, vector<8x1536xbf16>
    %c0_1 = arith.constant 0 : index
    %c0_2 = arith.constant 0 : index
    %1 = vector.load %arg2[%c0_1, %c0_2] : memref<1536x384xbf16, #tpu.memory_space<vmem>>, vector<1536x384xbf16>
    %cst = arith.constant dense<0.000000e+00> : vector<8x384xf32>
    %2 = tpu.matmul %0, %1, %cst {dimension_numbers = #tpu.dot_dimension_numbers<[1], [0], [0], [1], [0, 0, 1, 1], [], []>} : vector<8x1536xbf16>, vector<1536x384xbf16>, vector<8x384xf32> -> vector<8x384xf32>
    %c0_3 = arith.constant 0 : index
    %c0_4 = arith.constant 0 : index
    %3 = vector.load %arg3[%c0_3, %c0_4] : memref<1x384xf32, #tpu.memory_space<vmem>>, vector<1x384xf32>
    %4 = vector.broadcast %3 : vector<1x384xf32> to vector<8x384xf32>
    %5 = arith.addf %2, %4 : vector<8x384xf32>
    %6 = vector.extract_strided_slice %5 {offsets = [0, 0], sizes = [8, 128], strides = [1, 1]} : vector<8x384xf32> to vector<8x128xf32>
    %7 = arith.negf %6 : vector<8x128xf32>
    %8 = math.exp %7 : vector<8x128xf32>
    %cst_5 = arith.constant 1.000000e+00 : f32
    %9 = vector.broadcast %cst_5 : f32 to vector<8x128xf32>
    %10 = arith.addf %9, %8 : vector<8x128xf32>
    %11 = arith.divf %9, %10 : vector<8x128xf32>
    %12 = vector.extract_strided_slice %5 {offsets = [0, 128], sizes = [8, 128], strides = [1, 1]} : vector<8x384xf32> to vector<8x128xf32>
    %13 = math.tanh %12 : vector<8x128xf32>
    %14 = vector.extract_strided_slice %5 {offsets = [0, 256], sizes = [8, 128], strides = [1, 1]} : vector<8x384xf32> to vector<8x128xf32>
    %15 = arith.negf %14 : vector<8x128xf32>
    %16 = math.exp %15 : vector<8x128xf32>
    %cst_6 = arith.constant 1.000000e+00 : f32
    %17 = vector.broadcast %cst_6 : f32 to vector<8x128xf32>
    %18 = arith.addf %17, %16 : vector<8x128xf32>
    %19 = arith.divf %17, %18 : vector<8x128xf32>
    %20 = arith.mulf %11, %13 : vector<8x128xf32>
    %21 = math.tanh %20 : vector<8x128xf32>
    %22 = arith.mulf %19, %21 : vector<8x128xf32>
    %c0_7 = arith.constant 0 : index
    %c0_8 = arith.constant 0 : index
    %23 = vector.load %arg4[%c0_7, %c0_8] : memref<128x128xf32, #tpu.memory_space<vmem>>, vector<128x128xf32>
    %cst_9 = arith.constant dense<0.000000e+00> : vector<8x128xf32>
    %24 = tpu.matmul %22, %23, %cst_9 {dimension_numbers = #tpu.dot_dimension_numbers<[1], [0], [0], [1], [0, 0, 1, 1], [], []>} : vector<8x128xf32>, vector<128x128xf32>, vector<8x128xf32> -> vector<8x128xf32>
    %c0_10 = arith.constant 0 : index
    %c0_11 = arith.constant 0 : index
    %25 = vector.load %arg5[%c0_10, %c0_11] : memref<1x128xf32, #tpu.memory_space<vmem>>, vector<1x128xf32>
    %26 = vector.broadcast %25 : vector<1x128xf32> to vector<8x128xf32>
    %27 = arith.addf %24, %26 : vector<8x128xf32>
    %c0_12 = arith.constant 0 : index
    %c0_13 = arith.constant 0 : index
    %28 = vector.load %arg6[%c0_12, %c0_13] : memref<8x128xf32, #tpu.memory_space<vmem>>, vector<8x128xf32>
    tpu.vector_store %arg6[%c0_12, %c0_13], %27 {strides = array<i32>} : memref<8x128xf32, #tpu.memory_space<vmem>>, vector<8x128xf32>,
    return
  }
  func.func @transform_0(%arg0: i32) -> (i32, i32) {
    %c0_i32 = arith.constant 0 : i32
    %c0_i32_0 = arith.constant 0 : i32
    return %arg0, %c0_i32 : i32, i32
  }
  func.func @transform_1(%arg0: i32) -> (i32, i32) {
    %c0_i32 = arith.constant 0 : i32
    %c0_i32_0 = arith.constant 0 : i32
    %c0_i32_1 = arith.constant 0 : i32
    return %c0_i32, %c0_i32_0 : i32, i32
  }
  func.func @transform_2(%arg0: i32) -> (i32, i32) {
    %c0_i32 = arith.constant 0 : i32
    %c0_i32_0 = arith.constant 0 : i32
    %c0_i32_1 = arith.constant 0 : i32
    return %c0_i32, %c0_i32_0 : i32, i32
  }
  func.func @transform_3(%arg0: i32) -> (i32, i32) {
    %c0_i32 = arith.constant 0 : i32
    %c0_i32_0 = arith.constant 0 : i32
    %c0_i32_1 = arith.constant 0 : i32
    return %c0_i32, %c0_i32_0 : i32, i32
  }
  func.func @transform_4(%arg0: i32) -> (i32, i32) {
    %c0_i32 = arith.constant 0 : i32
    %c0_i32_0 = arith.constant 0 : i32
    %c0_i32_1 = arith.constant 0 : i32
    return %c0_i32, %c0_i32_0 : i32, i32
  }
  func.func @transform_5(%arg0: i32) -> (i32, i32) {
    %c0_i32 = arith.constant 0 : i32
    %c0_i32_0 = arith.constant 0 : i32
    return %arg0, %c0_i32 : i32, i32
  }
}

</mosaic_0001>

<bundles_post_ra>
// kernel: tpu_custom_call.1
= control target key start
LH: loop header
LB: loop body
LE: loop exit
PB: predicated region body
PF: predicated region fallthrough
CT: control target
= control target key end

     0   :  { %10 = vsyncpa [#allocation3], 0  ;;  %s3965_s0 = inlined_call_operand.hbm [shape: bf16[8,1536], index: 0, kind: input, shape index: {}]   ;;  %s3966_s1 = inlined_call_operand.hbm [shape: bf16[1536,384], index: 1, kind: input, shape index: {}]   ;;  %s3967_s2 = inlined_call_operand.hbm [shape: f32[1,384], index: 2, kind: input, shape index: {}]   ;;  %s3968_s3 = inlined_call_operand.hbm [shape: f32[128,128], index: 3, kind: input, shape index: {}]   ;;  %s3969_s4 = inlined_call_operand.hbm [shape: f32[1,128], index: 4, kind: input, shape index: {}]   ;;  %s3970_s5 = inlined_call_operand.hbm [shape: f32[8,128], index: 5, kind: output, shape index: {}]  }
   0x1   :  { %11 = vsyncpa [#allocation6], 0 }
   0x2   :  { %12 = vsyncpa [#allocation9], 0 }
   0x3   :  { %13 = vsyncpa [#allocation4], 0  ;;  %s3774_s18 = smov [#allocation5]   ;;  %s3634_s22 = scalar_lea.hbm %s3966_s1, 36864 }
   0x4   :  { %s29_s19 = sshll.u32 %s3774_s18, 4  ;;  %p3635_p0 = scmp.ne.s32.totalorder %s3966_s1, %s3634_s22  ;;  %s30_s19 = int_to_ptr.vmem [resolvable:$true] %s29_s19 }
   0x5   :  { %p3638_p1 = scmp.lt.u32.totalorder %s3634_s22, %s3966_s1 }
   0x7   :  { %p3640_p2 = pnand %p3638_p1, %p3635_p0 }
   0x9   :  { %3643 = shalt.err (!%p3640_p2)
}
   0xa   :  { %s3644_s27 = scalar_lea.vmem %s30_s19, 36864  ;;  %p3649_p4 = scmp.lt.s32.totalorder %s30_s19, %s30_s19 }
   0xb   :  { %p3645_p3 = scmp.ne.s32.totalorder %s30_s19, %s3644_s27  ;;  %p3650_p5 = scmp.lt.s32.totalorder %s3644_s27, %s3644_s27 }
   0xd   :  { %p3651_p6 = por %p3650_p5, %p3649_p4 }
   0xf   :  { %p3652_p7 = pnand %p3651_p6, %p3645_p3 }
  0x11   :  { %3655 = shalt.err (!%p3652_p7)
}
  0x12   :  { %s3775_s28 = smov 192   ;;  %s3776_s29 = smov 12  }
  0x13   :  { %35 = dma.hbm_to_vmem [thread:$0]  %s3966_s1, 36864, %s30_s19, [#allocation6], %s3775_s28, %s3775_s28, %s3776_s29  }
  0x14   :  { %s3777_s7 = smov [#allocation8]   ;;  %s3656_s11 = scalar_lea.hbm %s3968_s3, 2048 }
  0x15   :  { %s51_s8 = sshll.u32 %s3777_s7, 4  ;;  %p3657_p8 = scmp.ne.s32.totalorder %s3968_s3, %s3656_s11  ;;  %s52_s8 = int_to_ptr.vmem [resolvable:$true] %s51_s8 }
  0x16   :  { %p3660_p9 = scmp.lt.u32.totalorder %s3656_s11, %s3968_s3 }
  0x18   :  { %p3662_p10 = pnand %p3660_p9, %p3657_p8 }
  0x1a   :  { %3665 = shalt.err (!%p3662_p10)
}
  0x1b   :  { %s3666_s16 = scalar_lea.vmem %s52_s8, 2048  ;;  %p3671_p12 = scmp.lt.s32.totalorder %s52_s8, %s52_s8 }
  0x1c   :  { %p3667_p11 = scmp.ne.s32.totalorder %s52_s8, %s3666_s16  ;;  %p3672_p13 = scmp.lt.s32.totalorder %s3666_s16, %s3666_s16 }
  0x1e   :  { %p3673_p0 = por %p3672_p13, %p3671_p12 }
  0x20   :  { %p3674_p1 = pnand %p3673_p0, %p3667_p11 }
  0x22   :  { %3677 = shalt.err (!%p3674_p1)
}
  0x23   :  { %s3778_s1 = smov 128   ;;  %s3779_s17 = smov 8  }
  0x24   :  { %57 = dma.hbm_to_vmem [thread:$0]  %s3968_s3, 2048, %s52_s8, [#allocation9], %s3778_s1, %s3778_s1, %s3779_s17  }
  0x25   :  { %s3780_s20 = smov [#allocation2]   ;;  %s3781_s22 = smov [#allocation7]  }
  0x26   :  { %s20_s21 = sshll.u32 %s3780_s20, 4  ;;  %s42_s23 = sshll.u32 %s3781_s22, 4  ;;  %s21_s21 = int_to_ptr.vmem [resolvable:$true] %s20_s21  ;;  %s43_s23 = int_to_ptr.vmem [resolvable:$true] %s42_s23 }
  0x27   :  { %s3678_s26 = scalar_lea.hbm %s3965_s0, 768 }
  0x28   :  { %p3679_p2 = scmp.ne.s32.totalorder %s3965_s0, %s3678_s26  ;;  %p3682_p3 = scmp.lt.u32.totalorder %s3678_s26, %s3965_s0 }
  0x2a   :  { %p3684_p4 = pnand %p3682_p3, %p3679_p2 }
  0x2c   :  { %3687 = shalt.err (!%p3684_p4)
}
  0x2d   :  { %s3688_s3 = scalar_lea.vmem %s21_s21, 768  ;;  %p3693_p6 = scmp.lt.s32.totalorder %s21_s21, %s21_s21 }
  0x2e   :  { %p3689_p5 = scmp.ne.s32.totalorder %s21_s21, %s3688_s3  ;;  %p3694_p7 = scmp.lt.s32.totalorder %s3688_s3, %s3688_s3 }
  0x30   :  { %p3695_p8 = por %p3694_p7, %p3693_p6 }
  0x32   :  { %p3696_p9 = pnand %p3695_p8, %p3689_p5 }
  0x34   :  { %3699 = shalt.err (!%p3696_p9)
}
  0x35   :  { %23 = dma.hbm_to_vmem [thread:$0]  %s3965_s0, 768, %s21_s21, [#allocation3]  }
  0x36   :  { %s3700_s10 = scalar_lea.hbm %s3967_s2, 48 }
  0x37   :  { %p3701_p10 = scmp.ne.s32.totalorder %s3967_s2, %s3700_s10  ;;  %p3704_p11 = scmp.lt.u32.totalorder %s3700_s10, %s3967_s2 }
  0x39   :  { %p3706_p12 = pnand %p3704_p11, %p3701_p10 }
  0x3b   :  { %3709 = shalt.err (!%p3706_p12)
}
  0x3c   :  { %s3710_s15 = scalar_lea.vmem %s43_s23, 48  ;;  %s3714_s16 = scalar_lea.vmem %s43_s23, 64 }
  0x3d   :  { %p3711_p13 = scmp.ne.s32.totalorder %s43_s23, %s3710_s15  ;;  %p3715_p0 = scmp.lt.s32.totalorder %s43_s23, %s43_s23 }
  0x3e   :  { %p3716_p1 = scmp.lt.s32.totalorder %s3714_s16, %s3710_s15 }
  0x40   :  { %p3717_p2 = por %p3716_p1, %p3715_p0 }
  0x42   :  { %p3718_p3 = pnand %p3717_p2, %p3711_p13 }
  0x44   :  { %3721 = shalt.err (!%p3718_p3)
}
  0x45   :  { %45 = dma.hbm_to_vmem [thread:$0]  %s3967_s2, 48, %s43_s23, [#allocation6]  }
  0x46   :  { %s3782_s17 = smov [#allocation10]   ;;  %s3722_s21 = scalar_lea.hbm %s3969_s4, 16 }
  0x47   :  { %s64_s18 = sshll.u32 %s3782_s17, 4  ;;  %p3723_p4 = scmp.ne.s32.totalorder %s3969_s4, %s3722_s21  ;;  %s65_s18 = int_to_ptr.vmem [resolvable:$true] %s64_s18 }
  0x48   :  { %p3726_p5 = scmp.lt.u32.totalorder %s3722_s21, %s3969_s4 }
  0x4a   :  { %p3728_p6 = pnand %p3726_p5, %p3723_p4 }
  0x4c   :  { %3731 = shalt.err (!%p3728_p6)
}
  0x4d   :  { %s3732_s27 = scalar_lea.vmem %s65_s18, 16  ;;  %s3736_s2 = scalar_lea.vmem %s65_s18, 32 }
  0x4e   :  { %p3733_p7 = scmp.ne.s32.totalorder %s65_s18, %s3732_s27  ;;  %p3737_p8 = scmp.lt.s32.totalorder %s65_s18, %s65_s18 }
  0x4f   :  { %p3738_p9 = scmp.lt.s32.totalorder %s3736_s2, %s3732_s27 }
  0x51   :  { %p3739_p10 = por %p3738_p9, %p3737_p8 }
  0x53   :  { %p3740_p11 = pnand %p3739_p10, %p3733_p7 }
  0x55   :  { %3743 = shalt.err (!%p3740_p11)
}
  0x56   :  { %67 = dma.hbm_to_vmem [thread:$0]  %s3969_s4, 16, %s65_s18, [#allocation9]  }
  0x57   :  { %3766 = dma.done.wait [#allocation3], 768  }
  0x58   :  { %3767 = vsyncadd [#allocation3], 4294966528 }
  0x59   :  { %3768 = dma.done.wait [#allocation6], 36912  }
  0x5a   :  { %3769 = vsyncadd [#allocation6], 4294930384 }
  0x5b   :  { %3770 = dma.done.wait [#allocation9], 2064  }
  0x5c   :  { %3771 = vsyncadd [#allocation9], 4294965232  ;;  %v3226_v0 = vld [vmem:[#allocation5 + $0x4] ss:$12 sps:$4 sm:$0xff]   ;;  %v3230_v2 = vld [vmem:[#allocation5] ss:$12 sps:$4 sm:$0xff]  }
  0x5d   :  { %v3228_v1 = vld [vmem:[#allocation5 + $0x184] ss:$12 sps:$4 sm:$0xff]   ;;  %2069 = vmatprep.subr.bf16.mxu1 %v3226_v0  ;;  %v3231_v3 = vld [vmem:[#allocation5 + $0x180] ss:$12 sps:$4 sm:$0xff]   ;;  %v3232_v4 = vld [vmem:[#allocation5 + $0x1c] ss:$12 sps:$4 sm:$0xff]  }
  0x5e   :  { %2110 = vmatprep.subr.bf16.mxu0 %v3228_v1  ;;  %2070 = vmatpush1.bf16.msra.mxu1 %v3230_v2  ;;  %v3234_v5 = vld [vmem:[#allocation5 + $0x19c] ss:$12 sps:$4 sm:$0xff]   ;;  %v3236_v6 = vld [vmem:[#allocation5 + $0x18] ss:$12 sps:$4 sm:$0xff]   ;;  %v3238_v8 = vld [vmem:[#allocation5 + $0x34] ss:$12 sps:$4 sm:$0xff]  }
  0x5f   :  { %2111 = vmatpush1.bf16.msra.mxu0 %v3231_v3  ;;  %2071 = vmatprep.subr.bf16.mxu1 %v3232_v4  ;;  %v3237_v7 = vld [vmem:[#allocation5 + $0x198] ss:$12 sps:$4 sm:$0xff]   ;;  %v3240_v9 = vld [vmem:[#allocation5 + $0x1b4] ss:$12 sps:$4 sm:$0xff]   ;;  %v3242_v10 = vld [vmem:[#allocation5 + $0x30] ss:$12 sps:$4 sm:$0xff]  }
  0x60   :  { %2112 = vmatprep.subr.bf16.mxu0 %v3234_v5  ;;  %v3243_v11 = vld [vmem:[#allocation5 + $0x1b0] ss:$12 sps:$4 sm:$0xff]   ;;  %v3244_v12 = vld [vmem:[#allocation5 + $0x4c] ss:$12 sps:$4 sm:$0xff]   ;;  %v3248_v14 = vld [vmem:[#allocation5 + $0x48] ss:$12 sps:$4 sm:$0xff]  }
  0x61   :  { %v3246_v13 = vld [vmem:[#allocation5 + $0x1cc] ss:$12 sps:$4 sm:$0xff]   ;;  %v3249_v15 = vld [vmem:[#allocation5 + $0x1c8] ss:$12 sps:$4 sm:$0xff]   ;;  %v3250_v16 = vld [vmem:[#allocation5 + $0x64] ss:$12 sps:$4 sm:$0xff]  }
  0x62   :  { %2072 = vmatpush1.bf16.msra.mxu1 %v3236_v6  ;;  %v3252_v17 = vld [vmem:[#allocation5 + $0x1e4] ss:$12 sps:$4 sm:$0xff]   ;;  %v3254_v18 = vld [vmem:[#allocation5 + $0x60] ss:$12 sps:$4 sm:$0xff]   ;;  %v3256_v20 = vld [vmem:[#allocation5 + $0x7c] ss:$12 sps:$4 sm:$0xff]  }
  0x63   :  { %2113 = vmatpush1.bf16.msra.mxu0 %v3237_v7  ;;  %2073 = vmatprep.subr.bf16.mxu1 %v3238_v8  ;;  %v3255_v19 = vld [vmem:[#allocation5 + $0x1e0] ss:$12 sps:$4 sm:$0xff]   ;;  %v3258_v21 = vld [vmem:[#allocation5 + $0x1fc] ss:$12 sps:$4 sm:$0xff]   ;;  %v3260_v22 = vld [vmem:[#allocation5 + $0x78] ss:$12 sps:$4 sm:$0xff]  }
  0x64   :  { %2114 = vmatprep.subr.bf16.mxu0 %v3240_v9  ;;  %v3261_v23 = vld [vmem:[#allocation5 + $0x1f8] ss:$12 sps:$4 sm:$0xff]   ;;  %v3262_v24 = vld [vmem:[#allocation5 + $0x94] ss:$12 sps:$4 sm:$0xff]   ;;  %v3266_v26 = vld [vmem:[#allocation5 + $0x90] ss:$12 sps:$4 sm:$0xff]  }
  0x65   :  { %v3264_v25 = vld [vmem:[#allocation5 + $0x214] ss:$12 sps:$4 sm:$0xff]   ;;  %v3267_v27 = vld [vmem:[#allocation5 + $0x210] ss:$12 sps:$4 sm:$0xff]   ;;  %v3268_v28 = vld [vmem:[#allocation5 + $0xac] ss:$12 sps:$4 sm:$0xff]  }
  0x66   :  { %2074 = vmatpush1.bf16.msra.mxu1 %v3242_v10  ;;  %v3270_v29 = vld [vmem:[#allocation5 + $0x22c] ss:$12 sps:$4 sm:$0xff]   ;;  %v3272_v30 = vld [vmem:[#allocation5 + $0xa8] ss:$12 sps:$4 sm:$0xff]   ;;  %v3274_v32 = vld [vmem:[#allocation5 + $0xc4] ss:$12 sps:$4 sm:$0xff]  }
  0x67   :  { %2115 = vmatpush1.bf16.msra.mxu0 %v3243_v11  ;;  %2075 = vmatprep.subr.bf16.mxu1 %v3244_v12  ;;  %v3273_v31 = vld [vmem:[#allocation5 + $0x228] ss:$12 sps:$4 sm:$0xff]   ;;  %v3276_v33 = vld [vmem:[#allocation5 + $0x244] ss:$12 sps:$4 sm:$0xff]   ;;  %v3278_v34 = vld [vmem:[#allocation5 + $0xc0] ss:$12 sps:$4 sm:$0xff]  }
  0x68   :  { %2116 = vmatprep.subr.bf16.mxu0 %v3246_v13  ;;  %v3279_v35 = vld [vmem:[#allocation5 + $0x240] ss:$12 sps:$4 sm:$0xff]   ;;  %v3280_v36 = vld [vmem:[#allocation5 + $0xdc] ss:$12 sps:$4 sm:$0xff]   ;;  %v3284_v38 = vld [vmem:[#allocation5 + $0xd8] ss:$12 sps:$4 sm:$0xff]  }
  0x69   :  { %v3282_v37 = vld [vmem:[#allocation5 + $0x25c] ss:$12 sps:$4 sm:$0xff]   ;;  %v3285_v39 = vld [vmem:[#allocation5 + $0x258] ss:$12 sps:$4 sm:$0xff]   ;;  %v3286_v40 = vld [vmem:[#allocation5 + $0xf4] ss:$12 sps:$4 sm:$0xff]  }
  0x6a   :  { %2076 = vmatpush1.bf16.msra.mxu1 %v3248_v14  ;;  %v3288_v41 = vld [vmem:[#allocation5 + $0x274] ss:$12 sps:$4 sm:$0xff]   ;;  %v3290_v42 = vld [vmem:[#allocation5 + $0xf0] ss:$12 sps:$4 sm:$0xff]   ;;  %v3292_v44 = vld [vmem:[#allocation5 + $0x10c] ss:$12 sps:$4 sm:$0xff]  }
  0x6b   :  { %2117 = vmatpush1.bf16.msra.mxu0 %v3249_v15  ;;  %2077 = vmatprep.subr.bf16.mxu1 %v3250_v16  ;;  %v3291_v43 = vld [vmem:[#allocation5 + $0x270] ss:$12 sps:$4 sm:$0xff]   ;;  %v3294_v45 = vld [vmem:[#allocation5 + $0x28c] ss:$12 sps:$4 sm:$0xff]   ;;  %v3296_v46 = vld [vmem:[#allocation5 + $0x108] ss:$12 sps:$4 sm:$0xff]  }
  0x6c   :  { %2118 = vmatprep.subr.bf16.mxu0 %v3252_v17  ;;  %v84_v47 = vld [vmem:[#allocation2] sm:$0xff]  ;;  %v85_v49 = vld [vmem:[#allocation2 + $0x8] sm:$0xff]  ;;  %v3302_v54 = vld [vmem:[#allocation5 + $0x120] ss:$12 sps:$4 sm:$0xff]   ;;  %vm3784_vm0 = vmmov 0   ;;  %s3786_s4 = smov [#allocation11]  }
  0x6d   :  { %v3877_v48 = vcombine.high %v84_v47, %v84_v47  ;;  %v3297_v50 = vld [vmem:[#allocation5 + $0x288] ss:$12 sps:$4 sm:$0xff]   ;;  %v3298_v51 = vld [vmem:[#allocation5 + $0x124] ss:$12 sps:$4 sm:$0xff]   ;;  %v3879_v52 = vcombine.high %v85_v49, %v85_v49  ;;  %v3303_v55 = vld [vmem:[#allocation5 + $0x2a0] ss:$12 sps:$4 sm:$0xff]   ;;  %v3883_v6 = vcombine.low %v84_v47, %v84_v47  ;;  %v3885_v7 = vcombine.low %v85_v49, %v85_v49 }
  0x6e   :  { %2078 = vmatpush1.bf16.msra.mxu1 %v3254_v18  ;;  %v3300_v53 = vld [vmem:[#allocation5 + $0x2a4] ss:$12 sps:$4 sm:$0xff]   ;;  %v3304_v56 = vld [vmem:[#allocation5 + $0x13c] ss:$12 sps:$4 sm:$0xff]   ;;  %v3310_v60 = vld [vmem:[#allocation5 + $0x154] ss:$12 sps:$4 sm:$0xff]  }
  0x6f   :  { %2119 = vmatpush1.bf16.msra.mxu0 %v3255_v19  ;;  %2079 = vmatprep.subr.bf16.mxu1 %v3256_v20  ;;  %v3306_v57 = vld [vmem:[#allocation5 + $0x2bc] ss:$12 sps:$4 sm:$0xff]   ;;  %v3308_v58 = vld [vmem:[#allocation5 + $0x138] ss:$12 sps:$4 sm:$0xff]   ;;  %v3312_v61 = vld [vmem:[#allocation5 + $0x2d4] ss:$12 sps:$4 sm:$0xff]  }
  0x70   :  { %2120 = vmatprep.subr.bf16.mxu0 %v3258_v21  ;;  %2101 = vmatprep.mubr.bf16.mxu1 %v3877_v48  ;;  %v3309_v59 = vld [vmem:[#allocation5 + $0x2b8] ss:$12 sps:$4 sm:$0xff]   ;;  %v3314_v62 = vld [vmem:[#allocation5 + $0x150] ss:$12 sps:$4 sm:$0xff]   ;;  %v3320_v2 = vld [vmem:[#allocation5 + $0x168] ss:$12 sps:$4 sm:$0xff]  }
  0x71   :  { %2142 = vmatprep.mubr.bf16.mxu0 %v3879_v52  ;;  %v3315_v63 = vld [vmem:[#allocation5 + $0x2d0] ss:$12 sps:$4 sm:$0xff]   ;;  %v3316_v0 = vld [vmem:[#allocation5 + $0x16c] ss:$12 sps:$4 sm:$0xff]   ;;  %v3321_v3 = vld [vmem:[#allocation5 + $0x2e8] ss:$12 sps:$4 sm:$0xff]  }
  0x72   :  { %2080 = vmatpush1.bf16.msra.mxu1 %v3260_v22  ;;  %v3318_v1 = vld [vmem:[#allocation5 + $0x2ec] ss:$12 sps:$4 sm:$0xff]   ;;  %v3328_v4 = vld [vmem:[#allocation5 + $0x304] ss:$12 sps:$4 sm:$0xff]   ;;  %v3329_v5 = vld [vmem:[#allocation5 + $0xc8] ss:$12 sps:$4 sm:$0xff]  }
  0x73   :  { %2121 = vmatpush1.bf16.msra.mxu0 %v3261_v23  ;;  %2081 = vmatprep.subr.bf16.mxu1 %v3262_v24  ;;  %v3326_v8 = vld [vmem:[#allocation5 + $0x300] ss:$12 sps:$4 sm:$0xff]   ;;  %v3330_v9 = vld [vmem:[#allocation5 + $0x8] ss:$12 sps:$4 sm:$0xff]   ;;  %v3331_v12 = vld [vmem:[#allocation5 + $0x318] ss:$12 sps:$4 sm:$0xff]  }
  0x74   :  { %2122 = vmatprep.subr.bf16.mxu0 %v3264_v25  ;;  %v3333_v10 = vld [vmem:[#allocation5 + $0x31c] ss:$12 sps:$4 sm:$0xff]   ;;  %v3334_v11 = vld [vmem:[#allocation5 + $0xe0] ss:$12 sps:$4 sm:$0xff]   ;;  %v3339_v15 = vld [vmem:[#allocation5 + $0xf8] ss:$12 sps:$4 sm:$0xff]  }
  0x75   :  { %v3335_v13 = vld [vmem:[#allocation5 + $0x20] ss:$12 sps:$4 sm:$0xff]   ;;  %v3336_v16 = vld [vmem:[#allocation5 + $0x330] ss:$12 sps:$4 sm:$0xff]   ;;  %v3340_v17 = vld [vmem:[#allocation5 + $0x38] ss:$12 sps:$4 sm:$0xff]  }
  0x76   :  { %2082 = vmatpush1.bf16.msra.mxu1 %v3266_v26  ;;  %v3338_v14 = vld [vmem:[#allocation5 + $0x334] ss:$12 sps:$4 sm:$0xff]   ;;  %v3343_v18 = vld [vmem:[#allocation5 + $0x34c] ss:$12 sps:$4 sm:$0xff]   ;;  %v3344_v19 = vld [vmem:[#allocation5 + $0x110] ss:$12 sps:$4 sm:$0xff]  }
  0x77   :  { %2123 = vmatpush1.bf16.msra.mxu0 %v3267_v27  ;;  %2083 = vmatprep.subr.bf16.mxu1 %v3268_v28  ;;  %v3341_v20 = vld [vmem:[#allocation5 + $0x348] ss:$12 sps:$4 sm:$0xff]   ;;  %v3345_v21 = vld [vmem:[#allocation5 + $0x50] ss:$12 sps:$4 sm:$0xff]   ;;  %v3346_v24 = vld [vmem:[#allocation5 + $0x360] ss:$12 sps:$4 sm:$0xff]  }
  0x78   :  { %2124 = vmatprep.subr.bf16.mxu0 %v3270_v29  ;;  %v3348_v22 = vld [vmem:[#allocation5 + $0x364] ss:$12 sps:$4 sm:$0xff]   ;;  %v3349_v23 = vld [vmem:[#allocation5 + $0x128] ss:$12 sps:$4 sm:$0xff]   ;;  %v3354_v27 = vld [vmem:[#allocation5 + $0x140] ss:$12 sps:$4 sm:$0xff]  }
  0x79   :  { %v3350_v25 = vld [vmem:[#allocation5 + $0x68] ss:$12 sps:$4 sm:$0xff]   ;;  %v3351_v28 = vld [vmem:[#allocation5 + $0x378] ss:$12 sps:$4 sm:$0xff]   ;;  %v3355_v29 = vld [vmem:[#allocation5 + $0x80] ss:$12 sps:$4 sm:$0xff]  }
  0x7a   :  { %2084 = vmatpush1.bf16.msra.mxu1 %v3272_v30  ;;  %v3353_v26 = vld [vmem:[#allocation5 + $0x37c] ss:$12 sps:$4 sm:$0xff]   ;;  %v3358_v30 = vld [vmem:[#allocation5 + $0x394] ss:$12 sps:$4 sm:$0xff]   ;;  %v3379_v49 = vld [vmem:[#allocation5 + $0x278] ss:$12 sps:$4 sm:$0xff]  }
  0x7b   :  { %2125 = vmatpush1.bf16.msra.mxu0 %v3273_v31  ;;  %2085 = vmatprep.subr.bf16.mxu1 %v3274_v32  ;;  %v3359_v31 = vld [vmem:[#allocation5 + $0x158] ss:$12 sps:$4 sm:$0xff]   ;;  %v3356_v32 = vld [vmem:[#allocation5 + $0x390] ss:$12 sps:$4 sm:$0xff]   ;;  %v3375_v47 = vld [vmem:[#allocation5 + $0x1a0] ss:$12 sps:$4 sm:$0xff]  }
  0x7c   :  { %2126 = vmatprep.subr.bf16.mxu0 %v3276_v33  ;;  %v3360_v33 = vld [vmem:[#allocation5 + $0x98] ss:$12 sps:$4 sm:$0xff]   ;;  %s2671_s29 = sshll.u32 %s3786_s4, 4  ;;  %s2672_s29 = int_to_ptr.vmem [resolvable:$true] %s2671_s29 }
  0x7d   :  { %s3744_s30 = scalar_lea.vmem %s2672_s29, 128  ;;  %p3749_p13 = scmp.lt.s32.totalorder %s2672_s29, %s2672_s29 }
  0x7e   :  { %2086 = vmatpush1.bf16.msra.mxu1 %v3278_v34  ;;  %v3363_v34 = vld [vmem:[#allocation5 + $0x3ac] ss:$12 sps:$4 sm:$0xff]   ;;  %p3745_p12 = scmp.ne.s32.totalorder %s2672_s29, %s3744_s30  ;;  %p3750_p0 = scmp.lt.s32.totalorder %s3744_s30, %s3744_s30 }
  0x7f   :  { %2127 = vmatpush1.bf16.msra.mxu0 %v3279_v35  ;;  %2087 = vmatprep.subr.bf16.mxu1 %v3280_v36  ;;  %v3364_v35 = vld [vmem:[#allocation5 + $0x170] ss:$12 sps:$4 sm:$0xff]   ;;  %v3361_v36 = vld [vmem:[#allocation5 + $0x3a8] ss:$12 sps:$4 sm:$0xff]  }
  0x80   :  { %2128 = vmatprep.subr.bf16.mxu0 %v3282_v37  ;;  %v3365_v37 = vld [vmem:[#allocation5 + $0xb0] ss:$12 sps:$4 sm:$0xff]   ;;  %p3751_p1 = por %p3750_p0, %p3749_p13 }
  0x82   :  { %2088 = vmatpush1.bf16.msra.mxu1 %v3284_v38  ;;  %v3368_v38 = vld [vmem:[#allocation5 + $0x3c4] ss:$12 sps:$4 sm:$0xff]   ;;  %p3752_p2 = pnand %p3751_p1, %p3745_p12 }
  0x83   :  { %2129 = vmatpush1.bf16.msra.mxu0 %v3285_v39  ;;  %2089 = vmatprep.subr.bf16.mxu1 %v3286_v40  ;;  %v3369_v39 = vld [vmem:[#allocation5 + $0x248] ss:$12 sps:$4 sm:$0xff]   ;;  %v3366_v40 = vld [vmem:[#allocation5 + $0x3c0] ss:$12 sps:$4 sm:$0xff]  }
  0x84   :  { %2130 = vmatprep.subr.bf16.mxu0 %v3288_v41  ;;  %v3370_v41 = vld [vmem:[#allocation5 + $0x188] ss:$12 sps:$4 sm:$0xff]  }
  0x86   :  { %2090 = vmatpush1.bf16.msra.mxu1 %v3290_v42  ;;  %v3373_v42 = vld [vmem:[#allocation5 + $0x3dc] ss:$12 sps:$4 sm:$0xff]  }
  0x87   :  { %2131 = vmatpush1.bf16.msra.mxu0 %v3291_v43  ;;  %2091 = vmatprep.subr.bf16.mxu1 %v3292_v44  ;;  %v3890_v43 = vld [vmem:[#allocation2 + $0x10] sm:$0xff] }
  0x88   :  { %2132 = vmatprep.subr.bf16.mxu0 %v3294_v45  ;;  %v3374_v44 = vld [vmem:[#allocation5 + $0x260] ss:$12 sps:$4 sm:$0xff]   ;;  %v3894_v45 = vcombine.high %v3890_v43, %v3890_v43 }
  0x8a   :  { %2092 = vmatpush1.bf16.msra.mxu1 %v3296_v46  ;;  %v3371_v46 = vld [vmem:[#allocation5 + $0x3d8] ss:$12 sps:$4 sm:$0xff]  }
  0x8b   :  { %2133 = vmatpush1.bf16.msra.mxu0 %v3297_v50  ;;  %2093 = vmatprep.subr.bf16.mxu1 %v3298_v51  ;;  %v3376_v50 = vld [vmem:[#allocation5 + $0x3f0] ss:$12 sps:$4 sm:$0xff]   ;;  %v3380_v51 = vld [vmem:[#allocation5 + $0x1b8] ss:$12 sps:$4 sm:$0xff]  }
  0x8c   :  { %2134 = vmatprep.subr.bf16.mxu0 %v3300_v53  ;;  %v3383_v53 = vld [vmem:[#allocation5 + $0x40c] ss:$12 sps:$4 sm:$0xff]  }
  0x8e   :  { %2094 = vmatpush1.bf16.msra.mxu1 %v3302_v54  ;;  %v3384_v54 = vld [vmem:[#allocation5 + $0x290] ss:$12 sps:$4 sm:$0xff]  }
  0x8f   :  { %2135 = vmatpush1.bf16.msra.mxu0 %v3303_v55  ;;  %2095 = vmatprep.subr.bf16.mxu1 %v3304_v56  ;;  %v3381_v55 = vld [vmem:[#allocation5 + $0x408] ss:$12 sps:$4 sm:$0xff]   ;;  %v3385_v56 = vld [vmem:[#allocation5 + $0x1d0] ss:$12 sps:$4 sm:$0xff]  }
  0x90   :  { %2136 = vmatprep.subr.bf16.mxu0 %v3306_v57  ;;  %v3388_v57 = vld [vmem:[#allocation5 + $0x424] ss:$12 sps:$4 sm:$0xff]  }
  0x92   :  { %2096 = vmatpush1.bf16.msra.mxu1 %v3308_v58  ;;  %v3389_v58 = vld [vmem:[#allocation5 + $0x2a8] ss:$12 sps:$4 sm:$0xff]  }
  0x93   :  { %2137 = vmatpush1.bf16.msra.mxu0 %v3309_v59  ;;  %2097 = vmatprep.subr.bf16.mxu1 %v3310_v60  ;;  %v3386_v59 = vld [vmem:[#allocation5 + $0x420] ss:$12 sps:$4 sm:$0xff]   ;;  %v3390_v60 = vld [vmem:[#allocation5 + $0x1e8] ss:$12 sps:$4 sm:$0xff]  }
  0x94   :  { %2138 = vmatprep.subr.bf16.mxu0 %v3312_v61  ;;  %v3394_v61 = vld [vmem:[#allocation5 + $0x2c0] ss:$12 sps:$4 sm:$0xff]  }
  0x96   :  { %2098 = vmatpush1.bf16.msra.mxu1 %v3314_v62  ;;  %v3391_v62 = vld [vmem:[#allocation5 + $0x438] ss:$12 sps:$4 sm:$0xff]  }
  0x97   :  { %2139 = vmatpush1.bf16.msra.mxu0 %v3315_v63  ;;  %2099 = vmatprep.subr.bf16.mxu1 %v3316_v0  ;;  %v3395_v63 = vld [vmem:[#allocation5 + $0x200] ss:$12 sps:$4 sm:$0xff]  }
  0x98   :  { %2140 = vmatprep.subr.bf16.mxu0 %v3318_v1  ;;  %v3398_v0 = vld [vmem:[#allocation5 + $0x454] ss:$12 sps:$4 sm:$0xff]   ;;  %v3399_v1 = vld [vmem:[#allocation5 + $0x2d8] ss:$12 sps:$4 sm:$0xff]  }
  0x9a   :  { %2100 = vmatpush1.bf16.msra.mxu1 %v3320_v2  ;;  %v3396_v2 = vld [vmem:[#allocation5 + $0x450] ss:$12 sps:$4 sm:$0xff]  }
  0x9b   :  { %2141 = vmatpush1.bf16.msra.mxu0 %v3321_v3  ;;  %2985 = vmatprep.subr.bf16.mxu1 %v3329_v5  ;;  %v3400_v3 = vld [vmem:[#allocation5 + $0x218] ss:$12 sps:$4 sm:$0xff]   ;;  %v3404_v5 = vld [vmem:[#allocation5 + $0x2f0] ss:$12 sps:$4 sm:$0xff]  }
  0x9c   :  { %2151 = vmatprep.subr.bf16.mxu0 %v3328_v4  ;;  %v3403_v4 = vld [vmem:[#allocation5 + $0x46c] ss:$12 sps:$4 sm:$0xff]  }
  0x9d   :  { %2102 = vmatmul.mubr.bf16.vlgmr.msra.gmra.mrb[0].mxu1 %v3883_v6 }
  0x9e   :  { %2143 = vmatmul.mubr.bf16.vlgmr.msra.gmra.mrb[0].mxu0 %v3885_v7  ;;  %2986 = vmatpush3.bf16.msra.mxu1 %v3330_v9  ;;  %v3410_v9 = vld [vmem:[#allocation5 + $0x484] ss:$12 sps:$4 sm:$0xff]  }
  0x9f   :  { %2152 = vmatpush1.bf16.msra.mxu0 %v3326_v8  ;;  %2987 = vmatprep.subr.bf16.mxu1 %v3334_v11  ;;  %v3405_v8 = vld [vmem:[#allocation5 + $0x230] ss:$12 sps:$4 sm:$0xff]   ;;  %v3408_v11 = vld [vmem:[#allocation5 + $0x480] ss:$12 sps:$4 sm:$0xff]  }
  0xa0   :  { %2153 = vmatprep.subr.bf16.mxu0 %v3333_v10  ;;  %2347 = vmatprep.mubr.bf16.mxu1 %v3877_v48  ;;  %v3378_v48 = vld [vmem:[#allocation5 + $0x3f4] ss:$12 sps:$4 sm:$0xff]  }
  0xa1   :  { %2183 = vmatprep.mubr.bf16.mxu0 %v3894_v45  ;;  %v3411_v10 = vld [vmem:[#allocation5 + $0x3c8] ss:$12 sps:$4 sm:$0xff]  }
  0xa2   :  { %2988 = vmatpush3.bf16.msra.mxu1 %v3335_v13  ;;  %v3412_v13 = vld [vmem:[#allocation5 + $0x308] ss:$12 sps:$4 sm:$0xff]  }
  0xa3   :  { %2154 = vmatpush1.bf16.msra.mxu0 %v3331_v12  ;;  %2989 = vmatprep.subr.bf16.mxu1 %v3339_v15  ;;  %v3901_v12 = vcombine.low %v3890_v43, %v3890_v43  ;;  %v3416_v15 = vld [vmem:[#allocation5 + $0x3e0] ss:$12 sps:$4 sm:$0xff]   ;;  %v3450_v43 = vld [vmem:[#allocation5 + $0x544] ss:$12 sps:$4 sm:$0xff]  }
  0xa4   :  { %2155 = vmatprep.subr.bf16.mxu0 %v3338_v14  ;;  %v3415_v14 = vld [vmem:[#allocation5 + $0x49c] ss:$12 sps:$4 sm:$0xff]  }
  0xa6   :  { %2990 = vmatpush3.bf16.msra.mxu1 %v3340_v17  ;;  %v3417_v17 = vld [vmem:[#allocation5 + $0x320] ss:$12 sps:$4 sm:$0xff]  }
  0xa7   :  { %2156 = vmatpush1.bf16.msra.mxu0 %v3336_v16  ;;  %2991 = vmatprep.subr.bf16.mxu1 %v3344_v19  ;;  %v3413_v16 = vld [vmem:[#allocation5 + $0x498] ss:$12 sps:$4 sm:$0xff]  }
  0xa8   :  { %2157 = vmatprep.subr.bf16.mxu0 %v3343_v18  ;;  %v3420_v18 = vld [vmem:[#allocation5 + $0x4b4] ss:$12 sps:$4 sm:$0xff]   ;;  %v3421_v19 = vld [vmem:[#allocation5 + $0x3f8] ss:$12 sps:$4 sm:$0xff]  }
  0xaa   :  { %2992 = vmatpush3.bf16.msra.mxu1 %v3345_v21  ;;  %v3422_v21 = vld [vmem:[#allocation5 + $0x338] ss:$12 sps:$4 sm:$0xff]  }
  0xab   :  { %2158 = vmatpush1.bf16.msra.mxu0 %v3341_v20  ;;  %2993 = vmatprep.subr.bf16.mxu1 %v3349_v23  ;;  %v3418_v20 = vld [vmem:[#allocation5 + $0x4b0] ss:$12 sps:$4 sm:$0xff]  }
  0xac   :  { %2159 = vmatprep.subr.bf16.mxu0 %v3348_v22  ;;  %v3425_v22 = vld [vmem:[#allocation5 + $0x4cc] ss:$12 sps:$4 sm:$0xff]   ;;  %v3426_v23 = vld [vmem:[#allocation5 + $0x410] ss:$12 sps:$4 sm:$0xff]  }
  0xae   :  { %2994 = vmatpush3.bf16.msra.mxu1 %v3350_v25  ;;  %v3430_v25 = vld [vmem:[#allocation5 + $0x4e4] ss:$12 sps:$4 sm:$0xff]  }
  0xaf   :  { %2160 = vmatpush1.bf16.msra.mxu0 %v3346_v24  ;;  %2995 = vmatprep.subr.bf16.mxu1 %v3354_v27  ;;  %v3423_v24 = vld [vmem:[#allocation5 + $0x4c8] ss:$12 sps:$4 sm:$0xff]   ;;  %v3428_v27 = vld [vmem:[#allocation5 + $0x4e0] ss:$12 sps:$4 sm:$0xff]  }
  0xb0   :  { %2161 = vmatprep.subr.bf16.mxu0 %v3353_v26  ;;  %v3431_v26 = vld [vmem:[#allocation5 + $0x428] ss:$12 sps:$4 sm:$0xff]  }
  0xb2   :  { %2996 = vmatpush3.bf16.msra.mxu1 %v3355_v29  ;;  %v3435_v29 = vld [vmem:[#allocation5 + $0x4fc] ss:$12 sps:$4 sm:$0xff]  }
  0xb3   :  { %2162 = vmatpush1.bf16.msra.mxu0 %v3351_v28  ;;  %2997 = vmatprep.subr.bf16.mxu1 %v3359_v31  ;;  %v3432_v28 = vld [vmem:[#allocation5 + $0x368] ss:$12 sps:$4 sm:$0xff]   ;;  %v3433_v31 = vld [vmem:[#allocation5 + $0x4f8] ss:$12 sps:$4 sm:$0xff]  }
  0xb4   :  { %2163 = vmatprep.subr.bf16.mxu0 %v3358_v30  ;;  %v3436_v30 = vld [vmem:[#allocation5 + $0x440] ss:$12 sps:$4 sm:$0xff]  }
  0xb6   :  { %2998 = vmatpush3.bf16.msra.mxu1 %v3360_v33  ;;  %v3440_v33 = vld [vmem:[#allocation5 + $0x514] ss:$12 sps:$4 sm:$0xff]  }
  0xb7   :  { %2164 = vmatpush1.bf16.msra.mxu0 %v3356_v32  ;;  %2999 = vmatprep.subr.bf16.mxu1 %v3364_v35  ;;  %v3437_v32 = vld [vmem:[#allocation5 + $0x380] ss:$12 sps:$4 sm:$0xff]  }
  0xb8   :  { %2165 = vmatprep.subr.bf16.mxu0 %v3363_v34  ;;  %v3441_v34 = vld [vmem:[#allocation5 + $0x458] ss:$12 sps:$4 sm:$0xff]   ;;  %v3906_v35 = vld [vmem:[#allocation2 + $0x18] sm:$0xff] }
  0xba   :  { %3000 = vmatpush3.bf16.msra.mxu1 %v3365_v37  ;;  %v3442_v37 = vld [vmem:[#allocation5 + $0x398] ss:$12 sps:$4 sm:$0xff]  }
  0xbb   :  { %2166 = vmatpush1.bf16.msra.mxu0 %v3361_v36  ;;  %3007 = vmatprep.subr.bf16.mxu1 %v3369_v39  ;;  %v3438_v36 = vld [vmem:[#allocation5 + $0x510] ss:$12 sps:$4 sm:$0xff]   ;;  %v3445_v39 = vld [vmem:[#allocation5 + $0x52c] ss:$12 sps:$4 sm:$0xff]  }
  0xbc   :  { %2167 = vmatprep.subr.bf16.mxu0 %v3368_v38  ;;  %v2689_v38 = vcombine.high %v3906_v35, %v3906_v35 }
  0xbd   :  { %2348 = vmatmul.mubr.bf16.vlgmr.msra.gmra.mrb[4].mxu1 %v3883_v6  ;;  %v3401_v6 = vld [vmem:[#allocation5 + $0x468] ss:$12 sps:$4 sm:$0xff]  }
  0xbe   :  { %3008 = vmatpush3.bf16.msra.mxu1 %v3370_v41  ;;  %2387 = vmatprep.mubr.bf16.mxu1 %v3879_v52  ;;  %v3393_v52 = vld [vmem:[#allocation5 + $0x43c] ss:$12 sps:$4 sm:$0xff]  }
  0xbf   :  { %2168 = vmatpush1.bf16.msra.mxu0 %v3366_v40  ;;  %3009 = vmatprep.subr.bf16.mxu1 %v3374_v44  ;;  %v3446_v40 = vld [vmem:[#allocation5 + $0x470] ss:$12 sps:$4 sm:$0xff]   ;;  %v3443_v41 = vld [vmem:[#allocation5 + $0x528] ss:$12 sps:$4 sm:$0xff]  }
  0xc0   :  { %2169 = vmatprep.subr.bf16.mxu0 %v3373_v42  ;;  %v3447_v42 = vld [vmem:[#allocation5 + $0x3b0] ss:$12 sps:$4 sm:$0xff]   ;;  %v3451_v44 = vld [vmem:[#allocation5 + $0x548] ss:$12 sps:$4 sm:$0xff]  }
  0xc2   :  { %3010 = vmatpush3.bf16.msra.mxu1 %v3375_v47  ;;  %v3455_v47 = vld [vmem:[#allocation5 + $0x55c] ss:$12 sps:$4 sm:$0xff]  }
  0xc3   :  { %2170 = vmatpush1.bf16.msra.mxu0 %v3371_v46  ;;  %3011 = vmatprep.subr.bf16.mxu1 %v3379_v49  ;;  %v3452_v46 = vld [vmem:[#allocation5 + $0x488] ss:$12 sps:$4 sm:$0xff]   ;;  %v3453_v49 = vld [vmem:[#allocation5 + $0x558] ss:$12 sps:$4 sm:$0xff]  }
  0xc4   :  { %2171 = vmatprep.subr.bf16.mxu0 %v3378_v48  ;;  %v3456_v48 = vld [vmem:[#allocation5 + $0x560] ss:$12 sps:$4 sm:$0xff]  }
  0xc6   :  { %3012 = vmatpush3.bf16.msra.mxu1 %v3380_v51  ;;  %v3460_v51 = vld [vmem:[#allocation5 + $0x574] ss:$12 sps:$4 sm:$0xff]  }
  0xc7   :  { %2172 = vmatpush1.bf16.msra.mxu0 %v3376_v50  ;;  %3013 = vmatprep.subr.bf16.mxu1 %v3384_v54  ;;  %v3457_v50 = vld [vmem:[#allocation5 + $0x4a0] ss:$12 sps:$4 sm:$0xff]   ;;  %v3458_v54 = vld [vmem:[#allocation5 + $0x570] ss:$12 sps:$4 sm:$0xff]  }
  0xc8   :  { %2173 = vmatprep.subr.bf16.mxu0 %v3383_v53  ;;  %v3461_v53 = vld [vmem:[#allocation5 + $0x578] ss:$12 sps:$4 sm:$0xff]  }
  0xca   :  { %3014 = vmatpush3.bf16.msra.mxu1 %v3385_v56  ;;  %v3465_v56 = vld [vmem:[#allocation5 + $0x58c] ss:$12 sps:$4 sm:$0xff]  }
  0xcb   :  { %2174 = vmatpush1.bf16.msra.mxu0 %v3381_v55  ;;  %3015 = vmatprep.subr.bf16.mxu1 %v3389_v58  ;;  %v3462_v55 = vld [vmem:[#allocation5 + $0x4b8] ss:$12 sps:$4 sm:$0xff]   ;;  %v3463_v58 = vld [vmem:[#allocation5 + $0x588] ss:$12 sps:$4 sm:$0xff]  }
  0xcc   :  { %2175 = vmatprep.subr.bf16.mxu0 %v3388_v57  ;;  %v3466_v57 = vld [vmem:[#allocation5 + $0x590] ss:$12 sps:$4 sm:$0xff]  }
  0xce   :  { %3016 = vmatpush3.bf16.msra.mxu1 %v3390_v60  ;;  %v3470_v60 = vld [vmem:[#allocation5 + $0x5a4] ss:$12 sps:$4 sm:$0xff]  }
  0xcf   :  { %2176 = vmatpush1.bf16.msra.mxu0 %v3386_v59  ;;  %3017 = vmatprep.subr.bf16.mxu1 %v3394_v61  ;;  %v3467_v59 = vld [vmem:[#allocation5 + $0x4d0] ss:$12 sps:$4 sm:$0xff]   ;;  %v3468_v61 = vld [vmem:[#allocation5 + $0x5a0] ss:$12 sps:$4 sm:$0xff]  }
  0xd0   :  { %2177 = vmatprep.subr.bf16.mxu0 %v3393_v52  ;;  %v3471_v52 = vld [vmem:[#allocation5 + $0x5a8] ss:$12 sps:$4 sm:$0xff]  }
  0xd2   :  { %3018 = vmatpush3.bf16.msra.mxu1 %v3395_v63  ;;  %v3475_v63 = vld [vmem:[#allocation5 + $0x5bc] ss:$12 sps:$4 sm:$0xff]  }
  0xd3   :  { %2178 = vmatpush1.bf16.msra.mxu0 %v3391_v62  ;;  %3019 = vmatprep.subr.bf16.mxu1 %v3399_v1  ;;  %v3472_v62 = vld [vmem:[#allocation5 + $0x4e8] ss:$12 sps:$4 sm:$0xff]   ;;  %v3473_v1 = vld [vmem:[#allocation5 + $0x5b8] ss:$12 sps:$4 sm:$0xff]  }
  0xd4   :  { %2179 = vmatprep.subr.bf16.mxu0 %v3398_v0  ;;  %v3476_v0 = vld [vmem:[#allocation5 + $0x5c0] ss:$12 sps:$4 sm:$0xff]  }
  0xd6   :  { %3020 = vmatpush3.bf16.msra.mxu1 %v3400_v3  ;;  %v3480_v3 = vld [vmem:[#allocation5 + $0x5d4] ss:$12 sps:$4 sm:$0xff]  }
  0xd7   :  { %2180 = vmatpush1.bf16.msra.mxu0 %v3396_v2  ;;  %3021 = vmatprep.subr.bf16.mxu1 %v3404_v5  ;;  %v3477_v2 = vld [vmem:[#allocation5 + $0x500] ss:$12 sps:$4 sm:$0xff]   ;;  %v3478_v5 = vld [vmem:[#allocation5 + $0x5d0] ss:$12 sps:$4 sm:$0xff]  }
  0xd8   :  { %2181 = vmatprep.subr.bf16.mxu0 %v3403_v4  ;;  %v3481_v4 = vld [vmem:[#allocation5 + $0x5d8] ss:$12 sps:$4 sm:$0xff]  }
  0xda   :  { %3022 = vmatpush3.bf16.msra.mxu1 %v3405_v8  ;;  %v3485_v8 = vld [vmem:[#allocation5 + $0x5ec] ss:$12 sps:$4 sm:$0xff]  }
  0xdb   :  { %2182 = vmatpush1.bf16.msra.mxu0 %v3401_v6  ;;  %3029 = vmatprep.subr.bf16.mxu1 %v3411_v10  ;;  %v3482_v6 = vld [vmem:[#allocation5 + $0x518] ss:$12 sps:$4 sm:$0xff]   ;;  %v3483_v10 = vld [vmem:[#allocation5 + $0x5e8] ss:$12 sps:$4 sm:$0xff]  }
  0xdc   :  { %2192 = vmatprep.subr.bf16.mxu0 %v3410_v9  ;;  %v3486_v9 = vld [vmem:[#allocation5 + $0x5f0] ss:$12 sps:$4 sm:$0xff]  }
  0xdd   :  { %2388 = vmatmul.mubr.bf16.vlgmr.msra.gmra.mrb[8].mxu1 %v3885_v7  ;;  %v3427_v7 = vld [vmem:[#allocation5 + $0x350] ss:$12 sps:$4 sm:$0xff]  }
  0xde   :  { %2184 = vmatmul.mubr.bf16.vlgmr.msra.gmra.mrb[0].mxu0 %v3901_v12  ;;  %3030 = vmatpush3.bf16.msra.mxu1 %v3412_v13  ;;  %v3493_v13 = vld [vmem:[#allocation5 + $0x6c8] ss:$12 sps:$4 sm:$0xff]  }
  0xdf   :  { %2193 = vmatpush1.bf16.msra.mxu0 %v3408_v11  ;;  %3031 = vmatprep.subr.bf16.mxu1 %v3416_v15  ;;  %v3487_v11 = vld [vmem:[#allocation5 + $0x530] ss:$12 sps:$4 sm:$0xff]   ;;  %v3494_v15 = vld [vmem:[#allocation5 + $0x608] ss:$12 sps:$4 sm:$0xff]  }
  0xe0   :  { %2194 = vmatprep.subr.bf16.mxu0 %v3415_v14  ;;  %2427 = vmatprep.mubr.bf16.mxu1 %v3894_v45  ;;  %v3448_v45 = vld [vmem:[#allocation5 + $0x540] ss:$12 sps:$4 sm:$0xff]  }
  0xe1   :  { %2224 = vmatprep.mubr.bf16.mxu0 %v2689_v38  ;;  %v3490_v14 = vld [vmem:[#allocation5 + $0x600] ss:$12 sps:$4 sm:$0xff]  }
  0xe2   :  { %3032 = vmatpush3.bf16.msra.mxu1 %v3417_v17  ;;  %v3913_v17 = vld [vmem:[#allocation2 + $0x20] sm:$0xff] }
  0xe3   :  { %2195 = vmatpush1.bf16.msra.mxu0 %v3413_v16  ;;  %3033 = vmatprep.subr.bf16.mxu1 %v3421_v19  ;;  %v2688_v16 = vcombine.low %v3906_v35, %v3906_v35  ;;  %v3498_v19 = vld [vmem:[#allocation5 + $0x6e0] ss:$12 sps:$4 sm:$0xff]  }
  0xe4   :  { %2196 = vmatprep.subr.bf16.mxu0 %v3420_v18  ;;  %v3497_v18 = vld [vmem:[#allocation5 + $0x61c] ss:$12 sps:$4 sm:$0xff]   ;;  %v3518_v35 = vld [vmem:[#allocation5 + $0x740] ss:$12 sps:$4 sm:$0xff]  }
  0xe6   :  { %3034 = vmatpush3.bf16.msra.mxu1 %v3422_v21  ;;  %v3495_v21 = vld [vmem:[#allocation5 + $0x618] ss:$12 sps:$4 sm:$0xff]  }
  0xe7   :  { %2197 = vmatpush1.bf16.msra.mxu0 %v3418_v20  ;;  %3035 = vmatprep.subr.bf16.mxu1 %v3426_v23  ;;  %v2691_v20 = vcombine.high %v3913_v17, %v3913_v17  ;;  %v3502_v23 = vld [vmem:[#allocation5 + $0x634] ss:$12 sps:$4 sm:$0xff]  }
  0xe8   :  { %2198 = vmatprep.subr.bf16.mxu0 %v3425_v22  ;;  %v3499_v22 = vld [vmem:[#allocation5 + $0x620] ss:$12 sps:$4 sm:$0xff]  }
  0xea   :  { %3036 = vmatpush3.bf16.msra.mxu1 %v3427_v7  ;;  %v3500_v7 = vld [vmem:[#allocation5 + $0x630] ss:$12 sps:$4 sm:$0xff]  }
  0xeb   :  { %2199 = vmatpush1.bf16.msra.mxu0 %v3423_v24  ;;  %3037 = vmatprep.subr.bf16.mxu1 %v3431_v26  ;;  %v3503_v24 = vld [vmem:[#allocation5 + $0x6f8] ss:$12 sps:$4 sm:$0xff]  }
  0xec   :  { %2200 = vmatprep.subr.bf16.mxu0 %v3430_v25  ;;  %v3504_v25 = vld [vmem:[#allocation5 + $0x638] ss:$12 sps:$4 sm:$0xff]  }
  0xed   :  { %v3507_v26 = vld [vmem:[#allocation5 + $0x64c] ss:$12 sps:$4 sm:$0xff]  }
  0xee   :  { %3038 = vmatpush3.bf16.msra.mxu1 %v3432_v28  ;;  %v3505_v28 = vld [vmem:[#allocation5 + $0x648] ss:$12 sps:$4 sm:$0xff]  }
  0xef   :  { %2201 = vmatpush1.bf16.msra.mxu0 %v3428_v27  ;;  %3039 = vmatprep.subr.bf16.mxu1 %v3436_v30  ;;  %v3508_v27 = vld [vmem:[#allocation5 + $0x710] ss:$12 sps:$4 sm:$0xff]  }
  0xf0   :  { %2202 = vmatprep.subr.bf16.mxu0 %v3435_v29  ;;  %v3509_v29 = vld [vmem:[#allocation5 + $0x650] ss:$12 sps:$4 sm:$0xff]  }
  0xf1   :  { %v3512_v30 = vld [vmem:[#allocation5 + $0x664] ss:$12 sps:$4 sm:$0xff]  }
  0xf2   :  { %3040 = vmatpush3.bf16.msra.mxu1 %v3437_v32  ;;  %v3510_v32 = vld [vmem:[#allocation5 + $0x660] ss:$12 sps:$4 sm:$0xff]  }
  0xf3   :  { %2203 = vmatpush1.bf16.msra.mxu0 %v3433_v31  ;;  %3041 = vmatprep.subr.bf16.mxu1 %v3441_v34  ;;  %v3513_v31 = vld [vmem:[#allocation5 + $0x728] ss:$12 sps:$4 sm:$0xff]  }
  0xf4   :  { %2204 = vmatprep.subr.bf16.mxu0 %v3440_v33  ;;  %v3514_v33 = vld [vmem:[#allocation5 + $0x668] ss:$12 sps:$4 sm:$0xff]  }
  0xf5   :  { %v3517_v34 = vld [vmem:[#allocation5 + $0x67c] ss:$12 sps:$4 sm:$0xff]  }
  0xf6   :  { %3042 = vmatpush3.bf16.msra.mxu1 %v3442_v37  ;;  %v3519_v37 = vld [vmem:[#allocation5 + $0x680] ss:$12 sps:$4 sm:$0xff]  }
  0xf7   :  { %2205 = vmatpush1.bf16.msra.mxu0 %v3438_v36  ;;  %3043 = vmatprep.subr.bf16.mxu1 %v3446_v40  ;;  %v3515_v36 = vld [vmem:[#allocation5 + $0x678] ss:$12 sps:$4 sm:$0xff]   ;;  %v3520_v40 = vld [vmem:[#allocation5 + $0x690] ss:$12 sps:$4 sm:$0xff]  }
  0xf8   :  { %2206 = vmatprep.subr.bf16.mxu0 %v3445_v39  ;;  %v3523_v39 = vld [vmem:[#allocation5 + $0x758] ss:$12 sps:$4 sm:$0xff]  }
  0xfa   :  { %3044 = vmatpush3.bf16.msra.mxu1 %v3447_v42  ;;  %v3527_v42 = vld [vmem:[#allocation5 + $0x6ac] ss:$12 sps:$4 sm:$0xff]  }
  0xfb   :  { %2207 = vmatpush1.bf16.msra.mxu0 %v3443_v41  ;;  %3051 = vmatprep.subr.bf16.mxu1 %v3451_v44  ;;  %v3524_v41 = vld [vmem:[#allocation5 + $0x698] ss:$12 sps:$4 sm:$0xff]   ;;  %v3525_v44 = vld [vmem:[#allocation5 + $0x6a8] ss:$12 sps:$4 sm:$0xff]  }
  0xfc   :  { %2208 = vmatprep.subr.bf16.mxu0 %v3450_v43  ;;  %v3528_v43 = vld [vmem:[#allocation5 + $0x770] ss:$12 sps:$4 sm:$0xff]  }
  0xfd   :  { %2428 = vmatmul.mubr.bf16.vlgmr.msra.gmra.mrb[12].mxu1 %v3901_v12  ;;  %v3492_v12 = vld [vmem:[#allocation5 + $0x604] ss:$12 sps:$4 sm:$0xff]  }
  0xfe   :  { %3052 = vmatpush3.bf16.msra.mxu1 %v3452_v46  ;;  %2467 = vmatprep.mubr.bf16.mxu1 %v2689_v38  ;;  %v3522_v38 = vld [vmem:[#allocation5 + $0x694] ss:$12 sps:$4 sm:$0xff]   ;;  %v3534_v46 = vld [vmem:[#allocation5 + $0x6c4] ss:$12 sps:$4 sm:$0xff]  }
  0xff   :  { %2209 = vmatpush1.bf16.msra.mxu0 %v3448_v45  ;;  %3053 = vmatprep.subr.bf16.mxu1 %v3456_v48  ;;  %v3529_v45 = vld [vmem:[#allocation5 + $0x6b0] ss:$12 sps:$4 sm:$0xff]   ;;  %v3919_v48 = vcombine.low %v3913_v17, %v3913_v17 }
 0x100   :  { %2210 = vmatprep.subr.bf16.mxu0 %v3455_v47  ;;  %v3535_v47 = vld [vmem:[#allocation5 + $0x848] ss:$12 sps:$4 sm:$0xff]   ;;  %v3571_v17 = vld [vmem:[#allocation5 + $0x830] ss:$12 sps:$4 sm:$0xff]  }
 0x102   :  { %3054 = vmatpush3.bf16.msra.mxu1 %v3457_v50  ;;  %v3532_v50 = vld [vmem:[#allocation5 + $0x6c0] ss:$12 sps:$4 sm:$0xff]  }
 0x103   :  { %2211 = vmatpush1.bf16.msra.mxu0 %v3453_v49  ;;  %3055 = vmatprep.subr.bf16.mxu1 %v3461_v53  ;;  %v3921_v49 = vld [vmem:[#allocation2 + $0x28] sm:$0xff] }
 0x104   :  { %2212 = vmatprep.subr.bf16.mxu0 %v3460_v51  ;;  %v3536_v51 = vld [vmem:[#allocation5 + $0x788] ss:$12 sps:$4 sm:$0xff]  }
 0x105   :  { %v3539_v53 = vld [vmem:[#allocation5 + $0x6dc] ss:$12 sps:$4 sm:$0xff]  }
 0x106   :  { %3056 = vmatpush3.bf16.msra.mxu1 %v3462_v55  ;;  %v3925_v55 = vcombine.high %v3921_v49, %v3921_v49 }
 0x107   :  { %2213 = vmatpush1.bf16.msra.mxu0 %v3458_v54  ;;  %3057 = vmatprep.subr.bf16.mxu1 %v3466_v57  ;;  %v3540_v54 = vld [vmem:[#allocation5 + $0x860] ss:$12 sps:$4 sm:$0xff]  }
 0x108   :  { %2214 = vmatprep.subr.bf16.mxu0 %v3465_v56  ;;  %v3537_v56 = vld [vmem:[#allocation5 + $0x6d8] ss:$12 sps:$4 sm:$0xff]   ;;  %v3541_v57 = vld [vmem:[#allocation5 + $0x7a0] ss:$12 sps:$4 sm:$0xff]  }
 0x10a   :  { %3058 = vmatpush3.bf16.msra.mxu1 %v3467_v59  ;;  %v3545_v59 = vld [vmem:[#allocation5 + $0x878] ss:$12 sps:$4 sm:$0xff]  }
 0x10b   :  { %2215 = vmatpush1.bf16.msra.mxu0 %v3463_v58  ;;  %3059 = vmatprep.subr.bf16.mxu1 %v3471_v52  ;;  %v3544_v58 = vld [vmem:[#allocation5 + $0x6f4] ss:$12 sps:$4 sm:$0xff]   ;;  %v3546_v52 = vld [vmem:[#allocation5 + $0x7b8] ss:$12 sps:$4 sm:$0xff]  }
 0x10c   :  { %2216 = vmatprep.subr.bf16.mxu0 %v3470_v60  ;;  %v3542_v60 = vld [vmem:[#allocation5 + $0x6f0] ss:$12 sps:$4 sm:$0xff]  }
 0x10e   :  { %3060 = vmatpush3.bf16.msra.mxu1 %v3472_v62  ;;  %v3550_v62 = vld [vmem:[#allocation5 + $0x890] ss:$12 sps:$4 sm:$0xff]  }
 0x10f   :  { %2217 = vmatpush1.bf16.msra.mxu0 %v3468_v61  ;;  %3061 = vmatprep.subr.bf16.mxu1 %v3476_v0  ;;  %v3549_v61 = vld [vmem:[#allocation5 + $0x70c] ss:$12 sps:$4 sm:$0xff]   ;;  %v3551_v0 = vld [vmem:[#allocation5 + $0x7d0] ss:$12 sps:$4 sm:$0xff]  }
 0x110   :  { %2218 = vmatprep.subr.bf16.mxu0 %v3475_v63  ;;  %v3547_v63 = vld [vmem:[#allocation5 + $0x708] ss:$12 sps:$4 sm:$0xff]  }
 0x112   :  { %3062 = vmatpush3.bf16.msra.mxu1 %v3477_v2  ;;  %v3555_v2 = vld [vmem:[#allocation5 + $0x8a8] ss:$12 sps:$4 sm:$0xff]  }
 0x113   :  { %2219 = vmatpush1.bf16.msra.mxu0 %v3473_v1  ;;  %3063 = vmatprep.subr.bf16.mxu1 %v3481_v4  ;;  %v3554_v1 = vld [vmem:[#allocation5 + $0x724] ss:$12 sps:$4 sm:$0xff]   ;;  %v3556_v4 = vld [vmem:[#allocation5 + $0x7e8] ss:$12 sps:$4 sm:$0xff]  }
 0x114   :  { %2220 = vmatprep.subr.bf16.mxu0 %v3480_v3  ;;  %v3552_v3 = vld [vmem:[#allocation5 + $0x720] ss:$12 sps:$4 sm:$0xff]  }
 0x116   :  { %3064 = vmatpush3.bf16.msra.mxu1 %v3482_v6  ;;  %v3560_v6 = vld [vmem:[#allocation5 + $0x8c0] ss:$12 sps:$4 sm:$0xff]  }
 0x117   :  { %2221 = vmatpush1.bf16.msra.mxu0 %v3478_v5  ;;  %3065 = vmatprep.subr.bf16.mxu1 %v3486_v9  ;;  %v3559_v5 = vld [vmem:[#allocation5 + $0x73c] ss:$12 sps:$4 sm:$0xff]   ;;  %v3561_v9 = vld [vmem:[#allocation5 + $0x800] ss:$12 sps:$4 sm:$0xff]  }
 0x118   :  { %2222 = vmatprep.subr.bf16.mxu0 %v3485_v8  ;;  %v3557_v8 = vld [vmem:[#allocation5 + $0x738] ss:$12 sps:$4 sm:$0xff]  }
 0x11a   :  { %3066 = vmatpush3.bf16.msra.mxu1 %v3487_v11  ;;  %v3565_v11 = vld [vmem:[#allocation5 + $0x8d8] ss:$12 sps:$4 sm:$0xff]  }
 0x11b   :  { %2223 = vmatpush1.bf16.msra.mxu0 %v3483_v10  ;;  %3073 = vmatprep.subr.bf16.mxu1 %v3493_v13  ;;  %v3564_v10 = vld [vmem:[#allocation5 + $0x754] ss:$12 sps:$4 sm:$0xff]   ;;  %v3566_v13 = vld [vmem:[#allocation5 + $0x818] ss:$12 sps:$4 sm:$0xff]  }
 0x11c   :  { %2233 = vmatprep.subr.bf16.mxu0 %v3492_v12  ;;  %v3562_v12 = vld [vmem:[#allocation5 + $0x750] ss:$12 sps:$4 sm:$0xff]  }
 0x11d   :  { %2468 = vmatmul.mubr.bf16.vlgmr.msra.gmra.mrb[16].mxu1 %v2688_v16 }
 0x11e   :  { %2225 = vmatmul.mubr.bf16.vlgmr.msra.gmra.mrb[0].mxu0 %v2688_v16  ;;  %3074 = vmatpush3.bf16.msra.mxu1 %v3494_v15  ;;  %v3570_v15 = vld [vmem:[#allocation5 + $0x8f0] ss:$12 sps:$4 sm:$0xff]   ;;  %v3567_v16 = vld [vmem:[#allocation5 + $0x768] ss:$12 sps:$4 sm:$0xff]  }
 0x11f   :  { %2234 = vmatpush1.bf16.msra.mxu0 %v3490_v14  ;;  %3075 = vmatprep.subr.bf16.mxu1 %v3498_v19  ;;  %v3569_v14 = vld [vmem:[#allocation5 + $0x76c] ss:$12 sps:$4 sm:$0xff]   ;;  %v3931_v19 = vcombine.low %v3921_v49, %v3921_v49 }
 0x120   :  { %2235 = vmatprep.subr.bf16.mxu0 %v3497_v18  ;;  %2507 = vmatprep.mubr.bf16.mxu1 %v2691_v20  ;;  %v3576_v18 = vld [vmem:[#allocation5 + $0x784] ss:$12 sps:$4 sm:$0xff]  }
 0x121   :  { %2265 = vmatprep.mubr.bf16.mxu0 %v2691_v20  ;;  %v3574_v20 = vld [vmem:[#allocation5 + $0x780] ss:$12 sps:$4 sm:$0xff]   ;;  %v3613_v49 = vld [vmem:[#allocation5 + $0x8b8] ss:$12 sps:$4 sm:$0xff]  }
 0x122   :  { %3076 = vmatpush3.bf16.msra.mxu1 %v3499_v22  ;;  %v3577_v22 = vld [vmem:[#allocation5 + $0x798] ss:$12 sps:$4 sm:$0xff]  }
 0x123   :  { %2236 = vmatpush1.bf16.msra.mxu0 %v3495_v21  ;;  %3077 = vmatprep.subr.bf16.mxu1 %v3503_v24  ;;  %v3579_v21 = vld [vmem:[#allocation5 + $0x79c] ss:$12 sps:$4 sm:$0xff]  }
 0x124   :  { %2237 = vmatprep.subr.bf16.mxu0 %v3502_v23  ;;  %v3582_v23 = vld [vmem:[#allocation5 + $0x7b4] ss:$12 sps:$4 sm:$0xff]   ;;  %v3580_v24 = vld [vmem:[#allocation5 + $0x7b0] ss:$12 sps:$4 sm:$0xff]  }
 0x126   :  { %3078 = vmatpush3.bf16.msra.mxu1 %v3504_v25  ;;  %v3583_v25 = vld [vmem:[#allocation5 + $0x7c8] ss:$12 sps:$4 sm:$0xff]  }
 0x127   :  { %2238 = vmatpush1.bf16.msra.mxu0 %v3500_v7  ;;  %3079 = vmatprep.subr.bf16.mxu1 %v3508_v27  ;;  %v3585_v7 = vld [vmem:[#allocation5 + $0x7cc] ss:$12 sps:$4 sm:$0xff]  }
 0x128   :  { %2239 = vmatprep.subr.bf16.mxu0 %v3507_v26  ;;  %v3588_v26 = vld [vmem:[#allocation5 + $0x7e4] ss:$12 sps:$4 sm:$0xff]   ;;  %v3586_v27 = vld [vmem:[#allocation5 + $0x7e0] ss:$12 sps:$4 sm:$0xff]  }
 0x12a   :  { %3080 = vmatpush3.bf16.msra.mxu1 %v3509_v29  ;;  %v3589_v29 = vld [vmem:[#allocation5 + $0x7f8] ss:$12 sps:$4 sm:$0xff]  }
 0x12b   :  { %2240 = vmatpush1.bf16.msra.mxu0 %v3505_v28  ;;  %3081 = vmatprep.subr.bf16.mxu1 %v3513_v31  ;;  %v3591_v28 = vld [vmem:[#allocation5 + $0x7fc] ss:$12 sps:$4 sm:$0xff]  }
 0x12c   :  { %2241 = vmatprep.subr.bf16.mxu0 %v3512_v30  ;;  %v3594_v30 = vld [vmem:[#allocation5 + $0x814] ss:$12 sps:$4 sm:$0xff]  }
 0x12e   :  { %3082 = vmatpush3.bf16.msra.mxu1 %v3514_v33  ;;  %v3592_v33 = vld [vmem:[#allocation5 + $0x810] ss:$12 sps:$4 sm:$0xff]  }
 0x12f   :  { %2242 = vmatpush1.bf16.msra.mxu0 %v3510_v32  ;;  %3083 = vmatprep.subr.bf16.mxu1 %v3518_v35  ;;  %v3597_v35 = vld [vmem:[#allocation5 + $0x82c] ss:$12 sps:$4 sm:$0xff]  }
 0x130   :  { %2243 = vmatprep.subr.bf16.mxu0 %v3517_v34 }
 0x132   :  { %3084 = vmatpush3.bf16.msra.mxu1 %v3519_v37  ;;  %v3595_v37 = vld [vmem:[#allocation5 + $0x828] ss:$12 sps:$4 sm:$0xff]  }
 0x133   :  { %2244 = vmatpush1.bf16.msra.mxu0 %v3515_v36  ;;  %3085 = vmatprep.subr.bf16.mxu1 %v3523_v39  ;;  %v3598_v39 = vld [vmem:[#allocation5 + $0x840] ss:$12 sps:$4 sm:$0xff]  }
 0x134   :  { %2245 = vmatprep.subr.bf16.mxu0 %v3522_v38  ;;  %v3600_v38 = vld [vmem:[#allocation5 + $0x844] ss:$12 sps:$4 sm:$0xff]  }
 0x136   :  { %3086 = vmatpush3.bf16.msra.mxu1 %v3524_v41  ;;  %v3601_v41 = vld [vmem:[#allocation5 + $0x858] ss:$12 sps:$4 sm:$0xff]  }
 0x137   :  { %2246 = vmatpush1.bf16.msra.mxu0 %v3520_v40  ;;  %3087 = vmatprep.subr.bf16.mxu1 %v3528_v43  ;;  %v3603_v40 = vld [vmem:[#allocation5 + $0x85c] ss:$12 sps:$4 sm:$0xff]  }
 0x138   :  { %2247 = vmatprep.subr.bf16.mxu0 %v3527_v42  ;;  %v3606_v42 = vld [vmem:[#allocation5 + $0x874] ss:$12 sps:$4 sm:$0xff]   ;;  %v3604_v43 = vld [vmem:[#allocation5 + $0x870] ss:$12 sps:$4 sm:$0xff]  }
 0x13a   :  { %3088 = vmatpush3.bf16.msra.mxu1 %v3529_v45  ;;  %v3607_v45 = vld [vmem:[#allocation5 + $0x888] ss:$12 sps:$4 sm:$0xff]  }
 0x13b   :  { %2248 = vmatpush1.bf16.msra.mxu0 %v3525_v44  ;;  %3095 = vmatprep.subr.bf16.mxu1 %v3535_v47  ;;  %v3609_v44 = vld [vmem:[#allocation5 + $0x88c] ss:$12 sps:$4 sm:$0xff]  }
 0x13c   :  { %2249 = vmatprep.subr.bf16.mxu0 %v3534_v46  ;;  %v3612_v46 = vld [vmem:[#allocation5 + $0x8a4] ss:$12 sps:$4 sm:$0xff]   ;;  %v3610_v47 = vld [vmem:[#allocation5 + $0x8a0] ss:$12 sps:$4 sm:$0xff]  }
 0x13d   :  { %2508 = vmatmul.mubr.bf16.vlgmr.msra.gmra.mrb[20].mxu1 %v3919_v48 }
 0x13e   :  { %3096 = vmatpush3.bf16.msra.mxu1 %v3536_v51  ;;  %2547 = vmatprep.mubr.bf16.mxu1 %v3925_v55 }
 0x13f   :  { %2250 = vmatpush1.bf16.msra.mxu0 %v3532_v50  ;;  %3097 = vmatprep.subr.bf16.mxu1 %v3540_v54  ;;  %v3618_v50 = vld [vmem:[#allocation5 + $0x8d4] ss:$12 sps:$4 sm:$0xff]   ;;  %v3616_v54 = vld [vmem:[#allocation5 + $0x8d0] ss:$12 sps:$4 sm:$0xff]  }
 0x140   :  { %2251 = vmatprep.subr.bf16.mxu0 %v3539_v53 }
 0x142   :  { %3098 = vmatpush3.bf16.msra.mxu1 %v3541_v57  ;;  %v3621_v57 = vld [vmem:[#allocation5 + $0x8ec] ss:$12 sps:$4 sm:$0xff]  }
 0x143   :  { %2252 = vmatpush1.bf16.msra.mxu0 %v3537_v56  ;;  %3099 = vmatprep.subr.bf16.mxu1 %v3545_v59  ;;  %v3619_v59 = vld [vmem:[#allocation5 + $0x8e8] ss:$12 sps:$4 sm:$0xff]  }
 0x144   :  { %2253 = vmatprep.subr.bf16.mxu0 %v3544_v58 }
 0x146   :  { %3100 = vmatpush3.bf16.msra.mxu1 %v3546_v52 }
 0x147   :  { %2254 = vmatpush1.bf16.msra.mxu0 %v3542_v60  ;;  %3101 = vmatprep.subr.bf16.mxu1 %v3550_v62  ;;  %v476_v60 = vlaneseq  ;;  %v3944_v62 = vld [vmem:[#allocation7] sm:$0x7] }
 0x148   :  { %2255 = vmatprep.subr.bf16.mxu0 %v3549_v61 }
 0x149   :  { %v3941_v52 = vshrl.u32 %v476_v60, 7 }
 0x14a   :  { %3102 = vmatpush3.bf16.msra.mxu1 %v3551_v0 }
 0x14b   :  { %2256 = vmatpush1.bf16.msra.mxu0 %v3547_v63  ;;  %3103 = vmatprep.subr.bf16.mxu1 %v3555_v2  ;;  %v486_v61 = vsub.s32 2, %v3941_v52  ;;  %v478_v60 = vsub.s32 0, %v3941_v52 }
 0x14c   :  { %2257 = vmatprep.subr.bf16.mxu0 %v3554_v1 }
 0x14d   :  { %v487_v63 = vrot.slane %v3944_v62, %v486_v61  ;;  %v482_v61 = vsub.s32 1, %v3941_v52 }
 0x14e   :  { %3104 = vmatpush3.bf16.msra.mxu1 %v3556_v4 }
 0x14f   :  { %2258 = vmatpush1.bf16.msra.mxu0 %v3552_v3  ;;  %3105 = vmatprep.subr.bf16.mxu1 %v3560_v6 }
 0x150   :  { %2259 = vmatprep.subr.bf16.mxu0 %v3559_v5 }
 0x152   :  { %3106 = vmatpush3.bf16.msra.mxu1 %v3561_v9 }
 0x153   :  { %2260 = vmatpush1.bf16.msra.mxu0 %v3557_v8  ;;  %3107 = vmatprep.subr.bf16.mxu1 %v3565_v11 }
 0x154   :  { %2261 = vmatprep.subr.bf16.mxu0 %v3564_v10 }
 0x156   :  { %3108 = vmatpush3.bf16.msra.mxu1 %v3566_v13 }
 0x157   :  { %2262 = vmatpush1.bf16.msra.mxu0 %v3562_v12  ;;  %3109 = vmatprep.subr.bf16.mxu1 %v3570_v15 }
 0x158   :  { %2263 = vmatprep.subr.bf16.mxu0 %v3569_v14 }
 0x15a   :  { %3110 = vmatpush3.bf16.msra.mxu1 %v3571_v17 }
 0x15b   :  { %2264 = vmatpush1.bf16.msra.mxu0 %v3567_v16 }
 0x15c   :  { %2274 = vmatprep.subr.bf16.mxu0 %v3576_v18 }
 0x15d   :  { %2548 = vmatmul.mubr.bf16.vlgmr.msra.gmra.mrb[24].mxu1 %v3931_v19 }
 0x15e   :  { %2266 = vmatmul.mubr.bf16.vlgmr.msra.gmra.mrb[0].mxu0 %v3919_v48  ;;  %v3615_v48 = vld [vmem:[#allocation5 + $0x8bc] ss:$12 sps:$4 sm:$0xff]  }
 0x15f   :  { %2275 = vmatpush1.bf16.msra.mxu0 %v3574_v20  ;;  %2306 = vmatprep.mubr.bf16.mxu0 %v3925_v55  ;;  %v2571_v20 = vld [vmem:[#allocation8] sm:$0xff] }
 0x160   :  { %2276 = vmatprep.subr.bf16.mxu0 %v3579_v21  ;;  %v2572_v21 = vld [vmem:[#allocation8 + $0x8] sm:$0xff] }
 0x163   :  { %2277 = vmatpush1.bf16.msra.mxu0 %v3577_v22  ;;  %v3170_v22 = vpack.c.bf16 %v2572_v21, %v2571_v20 }
 0x164   :  { %2278 = vmatprep.subr.bf16.mxu0 %v3582_v23  ;;  %v3783_v23 = vmov 0.0|0.0  }
 0x165   :  { %3169 = vmatprep.subr.bf16.mxu1 %v3783_v23 }
 0x166   :  { %3171 = vmatpush3.bf16.msra.mxu1 %v3170_v22 }
 0x167   :  { %2279 = vmatpush1.bf16.msra.mxu0 %v3580_v24  ;;  %3172 = vmatprep.subr.bf16.mxu1 %v3783_v23  ;;  %v2573_v24 = vld [vmem:[#allocation8 + $0x10] sm:$0xff] }
 0x168   :  { %2280 = vmatprep.subr.bf16.mxu0 %v3585_v7  ;;  %v2574_v7 = vld [vmem:[#allocation8 + $0x18] sm:$0xff] }
 0x16b   :  { %2281 = vmatpush1.bf16.msra.mxu0 %v3583_v25  ;;  %v3173_v25 = vpack.c.bf16 %v2574_v7, %v2573_v24 }
 0x16c   :  { %2282 = vmatprep.subr.bf16.mxu0 %v3588_v26  ;;  %v2575_v26 = vld [vmem:[#allocation8 + $0x20] sm:$0xff] }
 0x16d   :  { %3174 = vmatpush3.bf16.msra.mxu1 %v3173_v25 }
 0x16e   :  { %3175 = vmatprep.subr.bf16.mxu1 %v3783_v23 }
 0x16f   :  { %2283 = vmatpush1.bf16.msra.mxu0 %v3586_v27  ;;  %v2576_v27 = vld [vmem:[#allocation8 + $0x28] sm:$0xff] }
 0x170   :  { %2284 = vmatprep.subr.bf16.mxu0 %v3591_v28  ;;  %v3936_v31 = vpop.f32.mrb[0].mxu1  ;;  %v3176_v28 = vpack.c.bf16 %v2576_v27, %v2575_v26 }
 0x171   :  { %v3938_v32 = vpop.f32.mrb[1].mxu1 }
 0x172   :  { %v2107_v34 = vpop.f32.mrb[2].mxu1  ;;  %3177 = vmatpush3.bf16.msra.mxu1 %v3176_v28 }
 0x173   :  { %2285 = vmatpush1.bf16.msra.mxu0 %v3589_v29  ;;  %v2108_v36 = vpop.f32.mrb[3].mxu1  ;;  %3178 = vmatprep.subr.bf16.mxu1 %v3783_v23  ;;  %v2577_v29 = vld [vmem:[#allocation8 + $0x30] sm:$0xff]  ;;  %v2579_v34 = vld [vmem:[#allocation8 + $0x40] sm:$0xff] }
 0x174   :  { %2286 = vmatprep.subr.bf16.mxu0 %v3594_v30  ;;  %v2578_v30 = vld [vmem:[#allocation8 + $0x38] sm:$0xff] }
 0x177   :  { %2287 = vmatpush1.bf16.msra.mxu0 %v3592_v33  ;;  %v3179_v33 = vpack.c.bf16 %v2578_v30, %v2577_v29 }
 0x178   :  { %2288 = vmatprep.subr.bf16.mxu0 %v3597_v35  ;;  %v2580_v35 = vld [vmem:[#allocation8 + $0x48] sm:$0xff] }
 0x179   :  { %3180 = vmatpush3.bf16.msra.mxu1 %v3179_v33  ;;  %v3182_v36 = vpack.c.bf16 %v2580_v35, %v2579_v34 }
 0x17a   :  { %3181 = vmatprep.subr.bf16.mxu1 %v3783_v23 }
 0x17b   :  { %2289 = vmatpush1.bf16.msra.mxu0 %v3595_v37  ;;  %v2581_v37 = vld [vmem:[#allocation8 + $0x50] sm:$0xff] }
 0x17c   :  { %2290 = vmatprep.subr.bf16.mxu0 %v3600_v38  ;;  %v2582_v38 = vld [vmem:[#allocation8 + $0x58] sm:$0xff] }
 0x17d   :  { %3183 = vmatpush3.bf16.msra.mxu1 %v3182_v36 }
 0x17e   :  { %3184 = vmatprep.subr.bf16.mxu1 %v3783_v23 }
 0x17f   :  { %2291 = vmatpush1.bf16.msra.mxu0 %v3598_v39  ;;  %v3185_v39 = vpack.c.bf16 %v2582_v38, %v2581_v37 }
 0x180   :  { %2292 = vmatprep.subr.bf16.mxu0 %v3603_v40  ;;  %v2583_v40 = vld [vmem:[#allocation8 + $0x60] sm:$0xff] }
 0x181   :  { %3186 = vmatpush3.bf16.msra.mxu1 %v3185_v39 }
 0x182   :  { %3187 = vmatprep.subr.bf16.mxu1 %v3783_v23 }
 0x183   :  { %2293 = vmatpush1.bf16.msra.mxu0 %v3601_v41  ;;  %v2584_v41 = vld [vmem:[#allocation8 + $0x68] sm:$0xff] }
 0x184   :  { %2294 = vmatprep.subr.bf16.mxu0 %v3606_v42 }
 0x187   :  { %2295 = vmatpush1.bf16.msra.mxu0 %v3604_v43  ;;  %v3785_v43 = vmov 0.0  }
 0x188   :  { %2296 = vmatprep.subr.bf16.mxu0 %v3609_v44  ;;  %3166 = vmatprep.mubr.msk.f32.mxu1 %vm3784_vm0, %v3785_v43 }
 0x18b   :  { %2297 = vmatpush1.bf16.msra.mxu0 %v3607_v45  ;;  %v3188_v45 = vpack.c.bf16 %v2584_v41, %v2583_v40 }
 0x18c   :  { %2298 = vmatprep.subr.bf16.mxu0 %v3612_v46 }
 0x18d   :  { %3189 = vmatpush3.bf16.msra.mxu1 %v3188_v45 }
 0x18e   :  { %3190 = vmatprep.subr.bf16.mxu1 %v3783_v23 }
 0x18f   :  { %2299 = vmatpush1.bf16.msra.mxu0 %v3610_v47 }
 0x190   :  { %2300 = vmatprep.subr.bf16.mxu0 %v3615_v48  ;;  %v3001_v51 = vpop.f32.mrb[4].mxu1  ;;  %v2585_v48 = vld [vmem:[#allocation8 + $0x70] sm:$0xff] }
 0x191   :  { %v3002_v53 = vpop.f32.mrb[5].mxu1 }
 0x192   :  { %v3003_v55 = vadd.f32 %v3002_v53, %v3001_v51  ;;  %v3004_v56 = vpop.f32.mrb[6].mxu1 }
 0x193   :  { %2301 = vmatpush1.bf16.msra.mxu0 %v3613_v49  ;;  %v3005_v58 = vpop.f32.mrb[7].mxu1  ;;  %v2586_v49 = vld [vmem:[#allocation8 + $0x78] sm:$0xff] }
 0x194   :  { %2302 = vmatprep.subr.bf16.mxu0 %v3618_v50  ;;  %v2350_v0 = vadd.f32 %v3003_v55, %v487_v63  ;;  %v3191_v53 = vpack.c.bf16 %v2586_v49, %v2585_v48  ;;  %v479_v63 = vrot.slane %v3944_v62, %v478_v60 }
 0x196   :  { %3192 = vmatpush3.bf16.msra.mxu1 %v3191_v53 }
 0x197   :  { %2303 = vmatpush1.bf16.msra.mxu0 %v3616_v54 }
 0x198   :  { %2304 = vmatprep.subr.bf16.mxu0 %v3621_v57 }
 0x19b   :  { %2305 = vmatpush1.bf16.msra.mxu0 %v3619_v59 }
 0x19e   :  { %2307 = vmatmul.mubr.bf16.vlgmr.msra.gmra.mrb[0].mxu0 %v3931_v19 }
 0x1b0   :  { %v3023_v1 = vpop.f32.mrb[8].mxu1 }
 0x1b1   :  { %v3024_v2 = vpop.f32.mrb[9].mxu1 }
 0x1b2   :  { %v3025_v3 = vadd.f32 %v3024_v2, %v3023_v1  ;;  %v3026_v4 = vpop.f32.mrb[10].mxu1  ;;  %v2104_v1 = vadd.f32 %v3936_v31, %v479_v63 }
 0x1b3   :  { %v3027_v5 = vpop.f32.mrb[11].mxu1 }
 0x1b4   :  { %v2390_v6 = vadd.f32 %v3025_v3, %v2350_v0  ;;  %v483_v0 = vrot.slane %v3944_v62, %v482_v61 }
 0x1b6   :  { %v2106_v2 = vadd.f32 %v3938_v32, %v483_v0 }
 0x1d0   :  { %v3045_v8 = vpop.f32.mrb[12].mxu1 }
 0x1d1   :  { %v3046_v9 = vpop.f32.mrb[13].mxu1 }
 0x1d2   :  { %v3047_v10 = vadd.f32 %v3046_v9, %v3045_v8  ;;  %v3048_v11 = vpop.f32.mrb[14].mxu1 }
 0x1d3   :  { %v3049_v12 = vpop.f32.mrb[15].mxu1 }
 0x1d4   :  { %v2430_v13 = vadd.f32 %v3047_v10, %v2390_v6 }
 0x1f0   :  { %v3067_v14 = vpop.f32.mrb[16].mxu1 }
 0x1f1   :  { %v3068_v15 = vpop.f32.mrb[17].mxu1 }
 0x1f2   :  { %v3069_v16 = vadd.f32 %v3068_v15, %v3067_v14  ;;  %v3070_v17 = vpop.f32.mrb[18].mxu1 }
 0x1f3   :  { %v3071_v18 = vpop.f32.mrb[19].mxu1 }
 0x1f4   :  { %v2470_v19 = vadd.f32 %v3069_v16, %v2430_v13  ;;  %v2984_v18 = vld [vmem:[#allocation10] ss:$0 sm:$0xff] }
 0x210   :  { %v3089_v42 = vpop.f32.mrb[20].mxu1 }
 0x211   :  { %v3090_v44 = vpop.f32.mrb[21].mxu1 }
 0x212   :  { %v3091_v46 = vadd.f32 %v3090_v44, %v3089_v42  ;;  %v3092_v47 = vpop.f32.mrb[22].mxu1 }
 0x213   :  { %v3093_v50 = vpop.f32.mrb[23].mxu1 }
 0x214   :  { %v2510_v51 = vadd.f32 %v3091_v46, %v2470_v19 }
 0x230   :  { %v3111_v54 = vpop.f32.mrb[24].mxu1 }
 0x231   :  { %v3112_v55 = vpop.f32.mrb[25].mxu1 }
 0x232   :  { %v3113_v56 = vadd.f32 %v3112_v55, %v3111_v54  ;;  %v3114_v57 = vpop.f32.mrb[26].mxu1 }
 0x233   :  { %v3115_v58 = vpop.f32.mrb[27].mxu1 }
 0x234   :  { %v2550_v59 = vadd.f32 %v3113_v56, %v2510_v51 }
 0x236   :  { %v2983_v11 = vmul.f32 -1.442695, %v2550_v59 }
 0x271   :  { %v2308_v3 = vpop.f32.mrb[0].mxu0 }
 0x272   :  { %v3194_v4 = vadd.f32 %v2308_v3, %v2104_v1  ;;  %v2310_v5 = vpop.f32.mrb[1].mxu0 }
 0x273   :  { %v3196_v6 = vadd.f32 %v2310_v5, %v2106_v2  ;;  %v2312_v8 = vpop.f32.mrb[2].mxu0 }
 0x274   :  { %v2982_v9 = vmul.f32 -1.442695, %v3194_v4  ;;  %v2313_v10 = vpop.f32.mrb[3].mxu0 }
 0x276   :  { %3622 = vpow2.f32 %v2982_v9 }
 0x277   :  { %3624 = vpow2.f32 %v2983_v11 }
 0x278   :  { %3626 = vtanh.f32 %v3196_v6 }
 0x280   :  { %v3623_v12 = vpop.eup %3622 }
 0x281   :  { %v2558_v52 = vadd.f32 1.0, %v3623_v12  ;;  %v3625_v13 = vpop.eup %3624 }
 0x282   :  { %v2565_v62 = vadd.f32 1.0, %v3625_v13  ;;  %v3627_v14 = vpop.eup %3626 }
 0x283   :  { %3628 = vrcp.f32 %v2558_v52 }
 0x284   :  { %3630 = vrcp.f32 %v2565_v62 }
 0x28d   :  { %v3629_v31 = vpop.eup %3628 }
 0x28e   :  { %v2568_v15 = vmul.f32 %v3629_v31, %v3627_v14  ;;  %v3631_v32 = vpop.eup %3630 }
 0x290   :  { %3632 = vtanh.f32 %v2568_v15 }
 0x29a   :  { %v3633_v16 = vpop.eup %3632 }
 0x29b   :  { %v2570_v17 = vmul.f32 %v3633_v16, %v3631_v32 }
 0x29d   :  { %3167 = vmatmul.mubr.f32.vlgmr.msra.gmra.mrb[28].mxu1 %v2570_v17 }
 0x370   :  { %v2660_v19 = vpop.f32.mrb[28].mxu1 }
 0x371   :  { %v2661_v20 = vadd.f32 %v2984_v18, %v2660_v19  ;;  %v3168_v21 = vpop.f32.mrb[29].mxu1 }
 0x373   :  { %2664 = vst [vmem:[#allocation11] sm:$0xff] %v2661_v20 }
 0x374   :  { %3755 = shalt.err (!%p3752_p2)
}
 0x375   :  { %s3756_s7 = scalar_lea.hbm %s3970_s5, 128 }
 0x376   :  { %p3757_p3 = scmp.ne.s32.totalorder %s3970_s5, %s3756_s7  ;;  %p3760_p4 = scmp.lt.u32.totalorder %s3756_s7, %s3970_s5 }
 0x378   :  { %p3762_p5 = pnand %p3760_p4, %p3757_p3 }
 0x37a   :  { %3765 = shalt.err (!%p3762_p5)
}
 0x37b   :  { %2674 = dma.vmem_to_hbm [thread:$0]  %s2672_s29, 128, %s3970_s5, [#allocation4]  }
 0x37c   :  { %3772 = dma.done.wait [#allocation4], 128  }
 0x37d   :  { %3773 = vsyncadd [#allocation4], 4294967168 }
 0x37e   :  { %2678 = vsyncpa [#allocation3], 1 }
 0x37f   :  { %2679 = vsyncpa [#allocation6], 1 }
 0x380   :  { %2680 = vsyncpa [#allocation9], 1 }
 0x381   :  { %2681 = vsyncpa [#allocation4], 1 }

</bundles_post_ra>
